<compile_context>
chip_gen: v7x
topology: tpu7x:2x2x1
jax: 0.10.0
libtpu: 0.0.40
codegen_flags: <defaults>
</compile_context>

<pallas_src>
import jax
import jax.numpy as jnp
from jax.experimental import pallas as pl
from jax.experimental.pallas import tpu as pltpu


# ------------------------------- utilities ---------------------------------


def _round_up(x, m):
    return ((x + m - 1) // m) * m


def _full_spec(shape):
    # Whole-array block: block dims equal the full array dims (no (8,128) issue).
    n = len(shape)
    return pl.BlockSpec(shape, lambda i, _n=n: (0,) * _n)


# ------------------------------ fused kernel --------------------------------


def _make_fused_decoder_kernel(n_layers, hidden_pad):
    Hp = hidden_pad

    def kernel(*refs):
        ids_ref, embed_ref, h0_ref, c0_ref = refs[:4]
        wcat_refs = refs[4:4 + n_layers]                     # (in_pad+Hp, 4Hp) bf16
        bias_refs = refs[4 + n_layers:4 + 2 * n_layers]      # (1, 4Hp) f32
        wout_ref = refs[4 + 2 * n_layers]                    # (Hp, Vp) bf16
        bout_ref = refs[5 + 2 * n_layers]                    # (1, Vp) f32
        logits_ref, h_out_ref, c_out_ref = refs[6 + 2 * n_layers:]

        ids = ids_ref[...]                                   # (Bp, 1) int32
        Bp = ids.shape[0]
        Vp = embed_ref.shape[0]

        # Embedding gather as a one-hot matmul on the MXU (exact: 1.0 * row).
        onehot = (jax.lax.broadcasted_iota(jnp.int32, (Bp, Vp), 1)
                  == ids).astype(jnp.bfloat16)
        x = jnp.dot(onehot, embed_ref[...],
                    preferred_element_type=jnp.float32)      # (Bp, Ep) f32

        # Statically unrolled layer stack; all weights stay VMEM-resident.
        for layer in range(n_layers):
            h_prev = h0_ref[layer]                           # (Bp, Hp) f32
            c_prev = c0_ref[layer]
            xh = jnp.concatenate(
                [x.astype(jnp.bfloat16), h_prev.astype(jnp.bfloat16)], axis=1)
            gates = jnp.dot(xh, wcat_refs[layer][...],
                            preferred_element_type=jnp.float32)
            gates = gates + bias_refs[layer][...]            # f32 (Bp, 4Hp)
            # Lane-aligned gate blocks (PyTorch order i, f, g, o).
            i_g = jax.nn.sigmoid(gates[:, 0 * Hp:1 * Hp])
            f_g = jax.nn.sigmoid(gates[:, 1 * Hp:2 * Hp])
            g_g = jnp.tanh(gates[:, 2 * Hp:3 * Hp])
            o_g = jax.nn.sigmoid(gates[:, 3 * Hp:4 * Hp])
            c_new = f_g * c_prev + i_g * g_g
            h_new = o_g * jnp.tanh(c_new)
            h_out_ref[layer] = h_new
            c_out_ref[layer] = c_new
            x = h_new

        # Output projection (lane-dense: Vp is a multiple of 128).
        logits_ref[...] = (jnp.dot(x.astype(jnp.bfloat16), wout_ref[...],
                                   preferred_element_type=jnp.float32)
                           + bout_ref[...])

    return kernel


def fused_decoder_step(packed, ids_p, h0_p, c0_p):
    n_layers = packed["n_layers"]
    Hp, Vp = packed["Hp"], packed["Vp"]
    Bp = ids_p.shape[0]
    L = n_layers

    inputs = [ids_p, packed["embed"], h0_p, c0_p]
    inputs += list(packed["w_cat"])
    inputs += list(packed["bias"])
    inputs += [packed["w_out_t"], packed["b_out"]]

    in_specs = [_full_spec(a.shape) for a in inputs]
    out_specs = (_full_spec((Bp, Vp)),
                 _full_spec((L, Bp, Hp)),
                 _full_spec((L, Bp, Hp)))
    out_shape = (jax.ShapeDtypeStruct((Bp, Vp), jnp.float32),
                 jax.ShapeDtypeStruct((L, Bp, Hp), jnp.float32),
                 jax.ShapeDtypeStruct((L, Bp, Hp), jnp.float32))

    return pl.pallas_call(
        _make_fused_decoder_kernel(n_layers, Hp),
        grid=(1,),
        in_specs=in_specs,
        out_specs=out_specs,
        out_shape=out_shape,
        compiler_params=pltpu.CompilerParams(
            dimension_semantics=("arbitrary",),
            vmem_limit_bytes=32 * 1024 * 1024),
    )(*inputs)


# ----------------------- parameter init / packing ---------------------------


def init_decoder_params(key, voc_size, embed_size, hidden_size, n_layers):
    """Raw params in PyTorch layout (nn.Embedding / nn.LSTM / nn.Linear), f32."""
    keys = jax.random.split(key, 3 + 4 * n_layers)
    k = 1.0 / jnp.sqrt(hidden_size)
    params = {
        "embed": jax.random.normal(keys[0], (voc_size, embed_size), jnp.float32),
        "w_ih": [], "w_hh": [], "b_ih": [], "b_hh": [],
        "w_out": jax.random.uniform(keys[1], (voc_size, hidden_size),
                                    jnp.float32, -k, k),
        "b_out": jax.random.uniform(keys[2], (voc_size,), jnp.float32, -k, k),
    }
    for layer in range(n_layers):
        in_dim = embed_size if layer == 0 else hidden_size
        kk = keys[3 + 4 * layer: 3 + 4 * (layer + 1)]
        params["w_ih"].append(
            jax.random.uniform(kk[0], (4 * hidden_size, in_dim), jnp.float32, -k, k))
        params["w_hh"].append(
            jax.random.uniform(kk[1], (4 * hidden_size, hidden_size), jnp.float32, -k, k))
        params["b_ih"].append(
            jax.random.uniform(kk[2], (4 * hidden_size,), jnp.float32, -k, k))
        params["b_hh"].append(
            jax.random.uniform(kk[3], (4 * hidden_size,), jnp.float32, -k, k))
    return params


def pack_decoder_params(raw, voc_size, embed_size, hidden_size, n_layers):
    """Pad to (8,128)-aligned, per-gate lane-aligned blocks; stack W_ih/W_hh;
    cast matmul weights to bf16 (biases stay f32 for the f32 accumulation)."""
    H, E, V = hidden_size, embed_size, voc_size
    Hp, Ep, Vp = _round_up(H, 128), _round_up(E, 128), _round_up(V, 128)

    embed_p = jnp.zeros((Vp, Ep), jnp.float32).at[:V, :E].set(raw["embed"])

    w_cat, biases = [], []
    for layer in range(n_layers):
        in_dim = E if layer == 0 else H
        in_pad = Ep if layer == 0 else Hp
        w_ih, w_hh = raw["w_ih"][layer], raw["w_hh"][layer]
        b = raw["b_ih"][layer] + raw["b_hh"][layer]
        wc = jnp.zeros((in_pad + Hp, 4 * Hp), jnp.float32)
        bb = jnp.zeros((1, 4 * Hp), jnp.float32)
        for g in range(4):                     # gate order i, f, g, o
            wc = wc.at[:in_dim, g * Hp:g * Hp + H].set(
                w_ih[g * H:(g + 1) * H, :].T)
            wc = wc.at[in_pad:in_pad + H, g * Hp:g * Hp + H].set(
                w_hh[g * H:(g + 1) * H, :].T)
            bb = bb.at[0, g * Hp:g * Hp + H].set(b[g * H:(g + 1) * H])
        w_cat.append(wc.astype(jnp.bfloat16))
        biases.append(bb)

    w_out_t = jnp.zeros((Hp, Vp), jnp.float32).at[:H, :V].set(raw["w_out"].T)
    b_out = jnp.zeros((1, Vp), jnp.float32).at[0, :V].set(raw["b_out"])

    return {
        "n_layers": n_layers, "H": H, "E": E, "V": V,
        "Hp": Hp, "Ep": Ep, "Vp": Vp,
        "embed": embed_p.astype(jnp.bfloat16),
        "w_cat": w_cat,
        "bias": biases,
        "w_out_t": w_out_t.astype(jnp.bfloat16),
        "b_out": b_out,
    }


# --------------------------- module-level forward ----------------------------


def decoder_rnn_forward(packed, input_ids, hc):
    """Equivalent of DecoderRNN.forward:
       input_ids: (B,) int32 token ids; hc = (h, c), each (n_layers, B, H).
       Returns (logits (B, V), (h_new, c_new))."""
    h0, c0 = hc
    L = packed["n_layers"]
    B = int(input_ids.shape[0])
    H, V, Hp = packed["H"], packed["V"], packed["Hp"]
    Bp = _round_up(max(B, 1), 8)

    ids_p = jnp.zeros((Bp, 1), jnp.int32).at[:B, 0].set(input_ids.astype(jnp.int32))
    h0_p = jnp.zeros((L, Bp, Hp), jnp.float32).at[:, :B, :H].set(h0)
    c0_p = jnp.zeros((L, Bp, Hp), jnp.float32).at[:, :B, :H].set(c0)

    logits_p, h_new_p, c_new_p = fused_decoder_step(packed, ids_p, h0_p, c0_p)

    return logits_p[:B, :V], (h_new_p[:, :B, :H], c_new_p[:, :B, :H])


# --------------------------- pure-JAX reference ------------------------------


def _reference_forward(raw, input_ids, hc, n_layers):
    """Same math in plain JAX (bf16 weights/inputs, f32 accumulation)."""
    h0, c0 = hc
    H = h0.shape[-1]
    x = jnp.take(raw["embed"].astype(jnp.bfloat16), input_ids,
                 axis=0).astype(jnp.float32)
    h_out, c_out = [], []
    for layer in range(n_layers):
        w_ih = raw["w_ih"][layer].astype(jnp.bfloat16)
        w_hh = raw["w_hh"][layer].astype(jnp.bfloat16)
        b = (raw["b_ih"][layer] + raw["b_hh"][layer])[None, :]
        gates = (jnp.dot(x.astype(jnp.bfloat16), w_ih.T,
                         preferred_element_type=jnp.float32)
                 + jnp.dot(h0[layer].astype(jnp.bfloat16), w_hh.T,
                           preferred_element_type=jnp.float32)
                 + b)
        i_g = jax.nn.sigmoid(gates[:, 0 * H:1 * H])
        f_g = jax.nn.sigmoid(gates[:, 1 * H:2 * H])
        g_g = jnp.tanh(gates[:, 2 * H:3 * H])
        o_g = jax.nn.sigmoid(gates[:, 3 * H:4 * H])
        c_new = f_g * c0[layer] + i_g * g_g
        h_new = o_g * jnp.tanh(c_new)
        h_out.append(h_new)
        c_out.append(c_new)
        x = h_new
    logits = (jnp.dot(x.astype(jnp.bfloat16),
                      raw["w_out"].astype(jnp.bfloat16).T,
                      preferred_element_type=jnp.float32)
              + raw["b_out"][None, :])
    return logits, (jnp.stack(h_out, 0), jnp.stack(c_out, 0))


if __name__ == "__main__":
    # Small shapes consistent with the module's forward (single decode step).
    VOC, EMBED, HIDDEN, LAYERS, BATCH = 64, 32, 32, 3, 2

    key = jax.random.PRNGKey(0)
    pkey, ikey, hkey, ckey = jax.random.split(key, 4)

    raw = init_decoder_params(pkey, VOC, EMBED, HIDDEN, LAYERS)
    packed = pack_decoder_params(raw, VOC, EMBED, HIDDEN, LAYERS)

    input_ids = jax.random.randint(ikey, (BATCH,), 0, VOC, dtype=jnp.int32)
    h0 = jax.random.normal(hkey, (LAYERS, BATCH, HIDDEN), jnp.float32)
    c0 = jax.random.normal(ckey, (LAYERS, BATCH, HIDDEN), jnp.float32)

    logits, (h_new, c_new) = decoder_rnn_forward(packed, input_ids, (h0, c0))
    jax.block_until_ready((logits, h_new, c_new))

    # Sanity check against pure-JAX reference (same bf16/f32 mixed precision).
    ref_logits, (ref_h, ref_c) = _reference_forward(raw, input_ids, (h0, c0), LAYERS)

    assert logits.shape == (BATCH, VOC)
    assert h_new.shape == (LAYERS, BATCH, HIDDEN)
    assert c_new.shape == (LAYERS, BATCH, HIDDEN)
    assert jnp.allclose(logits, ref_logits, atol=1e-2), float(
        jnp.max(jnp.abs(logits - ref_logits)))
    assert jnp.allclose(h_new, ref_h, atol=1e-2)
    assert jnp.allclose(c_new, ref_c, atol=1e-2)

    print("KERNEL_OK")
</pallas_src>

<mosaic_0001>
module attributes {stable_mosaic.version = 11 : i64} {
  func.func @kernel(%arg0: i32, %arg1: memref<8x1xi32, #tpu.memory_space<vmem>>, %arg2: memref<128x128xbf16, #tpu.memory_space<vmem>>, %arg3: memref<3x8x128xf32, #tpu.memory_space<vmem>>, %arg4: memref<3x8x128xf32, #tpu.memory_space<vmem>>, %arg5: memref<256x512xbf16, #tpu.memory_space<vmem>>, %arg6: memref<256x512xbf16, #tpu.memory_space<vmem>>, %arg7: memref<256x512xbf16, #tpu.memory_space<vmem>>, %arg8: memref<1x512xf32, #tpu.memory_space<vmem>>, %arg9: memref<1x512xf32, #tpu.memory_space<vmem>>, %arg10: memref<1x512xf32, #tpu.memory_space<vmem>>, %arg11: memref<128x128xbf16, #tpu.memory_space<vmem>>, %arg12: memref<1x128xf32, #tpu.memory_space<vmem>>, %arg13: memref<8x128xf32, #tpu.memory_space<vmem>>, %arg14: memref<3x8x128xf32, #tpu.memory_space<vmem>>, %arg15: memref<3x8x128xf32, #tpu.memory_space<vmem>>) attributes {dimension_semantics = [#tpu.dimension_semantics<arbitrary>], iteration_bounds = array<i64: 1>, scalar_prefetch = 0 : i64, scratch_operands = 0 : i64, tpu.core_type = #tpu.core_type<tc>, window_params = [{pipeline_mode = #tpu.pipeline_mode<synchronous>, transform_indices = @transform_0, window_bounds = array<i64: 8, 1>}, {pipeline_mode = #tpu.pipeline_mode<synchronous>, transform_indices = @transform_1, window_bounds = array<i64: 128, 128>}, {pipeline_mode = #tpu.pipeline_mode<synchronous>, transform_indices = @transform_2, window_bounds = array<i64: 3, 8, 128>}, {pipeline_mode = #tpu.pipeline_mode<synchronous>, transform_indices = @transform_3, window_bounds = array<i64: 3, 8, 128>}, {pipeline_mode = #tpu.pipeline_mode<synchronous>, transform_indices = @transform_4, window_bounds = array<i64: 256, 512>}, {pipeline_mode = #tpu.pipeline_mode<synchronous>, transform_indices = @transform_5, window_bounds = array<i64: 256, 512>}, {pipeline_mode = #tpu.pipeline_mode<synchronous>, transform_indices = @transform_6, window_bounds = array<i64: 256, 512>}, {pipeline_mode = #tpu.pipeline_mode<synchronous>, transform_indices = @transform_7, window_bounds = array<i64: 1, 512>}, {pipeline_mode = #tpu.pipeline_mode<synchronous>, transform_indices = @transform_8, window_bounds = array<i64: 1, 512>}, {pipeline_mode = #tpu.pipeline_mode<synchronous>, transform_indices = @transform_9, window_bounds = array<i64: 1, 512>}, {pipeline_mode = #tpu.pipeline_mode<synchronous>, transform_indices = @transform_10, window_bounds = array<i64: 128, 128>}, {pipeline_mode = #tpu.pipeline_mode<synchronous>, transform_indices = @transform_11, window_bounds = array<i64: 1, 128>}, {pipeline_mode = #tpu.pipeline_mode<synchronous>, transform_indices = @transform_12, window_bounds = array<i64: 8, 128>}, {pipeline_mode = #tpu.pipeline_mode<synchronous>, transform_indices = @transform_13, window_bounds = array<i64: 3, 8, 128>}, {pipeline_mode = #tpu.pipeline_mode<synchronous>, transform_indices = @transform_14, window_bounds = array<i64: 3, 8, 128>}]} {
    %c0 = arith.constant 0 : index
    %c0_0 = arith.constant 0 : index
    %0 = vector.load %arg1[%c0, %c0_0] : memref<8x1xi32, #tpu.memory_space<vmem>>, vector<8x1xi32>
    %1 = tpu.iota {dimensions = array<i32: 1>} : vector<8x128xi32>
    %2 = vector.broadcast %0 : vector<8x1xi32> to vector<8x128xi32>
    %3 = arith.cmpi eq, %1, %2 : vector<8x128xi32>
    %4 = arith.extui %3 : vector<8x128xi1> to vector<8x128xi32>
    %5 = arith.sitofp %4 : vector<8x128xi32> to vector<8x128xf32>
    %6 = arith.truncf %5 : vector<8x128xf32> to vector<8x128xbf16>
    %c0_1 = arith.constant 0 : index
    %c0_2 = arith.constant 0 : index
    %7 = vector.load %arg2[%c0_1, %c0_2] : memref<128x128xbf16, #tpu.memory_space<vmem>>, vector<128x128xbf16>
    %cst = arith.constant dense<0.000000e+00> : vector<8x128xf32>
    %8 = tpu.matmul %6, %7, %cst {dimension_numbers = #tpu.dot_dimension_numbers<[1], [0], [0], [1], [0, 0, 1, 1], [], []>} : vector<8x128xbf16>, vector<128x128xbf16>, vector<8x128xf32> -> vector<8x128xf32>
    %c0_3 = arith.constant 0 : index
    %c0_4 = arith.constant 0 : index
    %c0_5 = arith.constant 0 : index
    %9 = vector.load %arg3[%c0_3, %c0_4, %c0_5] : memref<3x8x128xf32, #tpu.memory_space<vmem>>, vector<1x8x128xf32>
    %10 = vector.shape_cast %9 : vector<1x8x128xf32> to vector<8x128xf32>
    %c0_6 = arith.constant 0 : index
    %c0_7 = arith.constant 0 : index
    %c0_8 = arith.constant 0 : index
    %11 = vector.load %arg4[%c0_6, %c0_7, %c0_8] : memref<3x8x128xf32, #tpu.memory_space<vmem>>, vector<1x8x128xf32>
    %12 = vector.shape_cast %11 : vector<1x8x128xf32> to vector<8x128xf32>
    %13 = arith.truncf %8 : vector<8x128xf32> to vector<8x128xbf16>
    %14 = arith.truncf %10 : vector<8x128xf32> to vector<8x128xbf16>
    %15 = tpu.concatenate %13, %14 in 1 : vector<8x128xbf16>, vector<8x128xbf16> -> vector<8x256xbf16>
    %c0_9 = arith.constant 0 : index
    %c0_10 = arith.constant 0 : index
    %16 = vector.load %arg5[%c0_9, %c0_10] : memref<256x512xbf16, #tpu.memory_space<vmem>>, vector<256x512xbf16>
    %cst_11 = arith.constant dense<0.000000e+00> : vector<8x512xf32>
    %17 = tpu.matmul %15, %16, %cst_11 {dimension_numbers = #tpu.dot_dimension_numbers<[1], [0], [0], [1], [0, 0, 1, 1], [], []>} : vector<8x256xbf16>, vector<256x512xbf16>, vector<8x512xf32> -> vector<8x512xf32>
    %c0_12 = arith.constant 0 : index
    %c0_13 = arith.constant 0 : index
    %18 = vector.load %arg8[%c0_12, %c0_13] : memref<1x512xf32, #tpu.memory_space<vmem>>, vector<1x512xf32>
    %19 = vector.broadcast %18 : vector<1x512xf32> to vector<8x512xf32>
    %20 = arith.addf %17, %19 : vector<8x512xf32>
    %21 = vector.extract_strided_slice %20 {offsets = [0, 0], sizes = [8, 128], strides = [1, 1]} : vector<8x512xf32> to vector<8x128xf32>
    %22 = arith.negf %21 : vector<8x128xf32>
    %23 = math.exp %22 : vector<8x128xf32>
    %cst_14 = arith.constant 1.000000e+00 : f32
    %24 = vector.broadcast %cst_14 : f32 to vector<8x128xf32>
    %25 = arith.addf %24, %23 : vector<8x128xf32>
    %26 = arith.divf %24, %25 : vector<8x128xf32>
    %27 = vector.extract_strided_slice %20 {offsets = [0, 128], sizes = [8, 128], strides = [1, 1]} : vector<8x512xf32> to vector<8x128xf32>
    %28 = arith.negf %27 : vector<8x128xf32>
    %29 = math.exp %28 : vector<8x128xf32>
    %cst_15 = arith.constant 1.000000e+00 : f32
    %30 = vector.broadcast %cst_15 : f32 to vector<8x128xf32>
    %31 = arith.addf %30, %29 : vector<8x128xf32>
    %32 = arith.divf %30, %31 : vector<8x128xf32>
    %33 = vector.extract_strided_slice %20 {offsets = [0, 256], sizes = [8, 128], strides = [1, 1]} : vector<8x512xf32> to vector<8x128xf32>
    %34 = math.tanh %33 : vector<8x128xf32>
    %35 = vector.extract_strided_slice %20 {offsets = [0, 384], sizes = [8, 128], strides = [1, 1]} : vector<8x512xf32> to vector<8x128xf32>
    %36 = arith.negf %35 : vector<8x128xf32>
    %37 = math.exp %36 : vector<8x128xf32>
    %cst_16 = arith.constant 1.000000e+00 : f32
    %38 = vector.broadcast %cst_16 : f32 to vector<8x128xf32>
    %39 = arith.addf %38, %37 : vector<8x128xf32>
    %40 = arith.divf %38, %39 : vector<8x128xf32>
    %41 = arith.mulf %32, %12 : vector<8x128xf32>
    %42 = arith.mulf %26, %34 : vector<8x128xf32>
    %43 = arith.addf %41, %42 : vector<8x128xf32>
    %44 = math.tanh %43 : vector<8x128xf32>
    %45 = arith.mulf %40, %44 : vector<8x128xf32>
    %c0_17 = arith.constant 0 : index
    %c0_18 = arith.constant 0 : index
    %c0_19 = arith.constant 0 : index
    %46 = vector.load %arg14[%c0_17, %c0_18, %c0_19] : memref<3x8x128xf32, #tpu.memory_space<vmem>>, vector<1x8x128xf32>
    %47 = vector.shape_cast %46 : vector<1x8x128xf32> to vector<8x128xf32>
    %48 = vector.shape_cast %45 : vector<8x128xf32> to vector<1x8x128xf32>
    tpu.vector_store %arg14[%c0_17, %c0_18, %c0_19], %48 {strides = array<i32>} : memref<3x8x128xf32, #tpu.memory_space<vmem>>, vector<1x8x128xf32>,
    %c0_20 = arith.constant 0 : index
    %c0_21 = arith.constant 0 : index
    %c0_22 = arith.constant 0 : index
    %49 = vector.load %arg15[%c0_20, %c0_21, %c0_22] : memref<3x8x128xf32, #tpu.memory_space<vmem>>, vector<1x8x128xf32>
    %50 = vector.shape_cast %49 : vector<1x8x128xf32> to vector<8x128xf32>
    %51 = vector.shape_cast %43 : vector<8x128xf32> to vector<1x8x128xf32>
    tpu.vector_store %arg15[%c0_20, %c0_21, %c0_22], %51 {strides = array<i32>} : memref<3x8x128xf32, #tpu.memory_space<vmem>>, vector<1x8x128xf32>,
    %c1 = arith.constant 1 : index
    %c0_23 = arith.constant 0 : index
    %c0_24 = arith.constant 0 : index
    %52 = vector.load %arg3[%c1, %c0_23, %c0_24] : memref<3x8x128xf32, #tpu.memory_space<vmem>>, vector<1x8x128xf32>
    %53 = vector.shape_cast %52 : vector<1x8x128xf32> to vector<8x128xf32>
    %c1_25 = arith.constant 1 : index
    %c0_26 = arith.constant 0 : index
    %c0_27 = arith.constant 0 : index
    %54 = vector.load %arg4[%c1_25, %c0_26, %c0_27] : memref<3x8x128xf32, #tpu.memory_space<vmem>>, vector<1x8x128xf32>
    %55 = vector.shape_cast %54 : vector<1x8x128xf32> to vector<8x128xf32>
    %56 = arith.truncf %45 : vector<8x128xf32> to vector<8x128xbf16>
    %57 = arith.truncf %53 : vector<8x128xf32> to vector<8x128xbf16>
    %58 = tpu.concatenate %56, %57 in 1 : vector<8x128xbf16>, vector<8x128xbf16> -> vector<8x256xbf16>
    %c0_28 = arith.constant 0 : index
    %c0_29 = arith.constant 0 : index
    %59 = vector.load %arg6[%c0_28, %c0_29] : memref<256x512xbf16, #tpu.memory_space<vmem>>, vector<256x512xbf16>
    %cst_30 = arith.constant dense<0.000000e+00> : vector<8x512xf32>
    %60 = tpu.matmul %58, %59, %cst_30 {dimension_numbers = #tpu.dot_dimension_numbers<[1], [0], [0], [1], [0, 0, 1, 1], [], []>} : vector<8x256xbf16>, vector<256x512xbf16>, vector<8x512xf32> -> vector<8x512xf32>
    %c0_31 = arith.constant 0 : index
    %c0_32 = arith.constant 0 : index
    %61 = vector.load %arg9[%c0_31, %c0_32] : memref<1x512xf32, #tpu.memory_space<vmem>>, vector<1x512xf32>
    %62 = vector.broadcast %61 : vector<1x512xf32> to vector<8x512xf32>
    %63 = arith.addf %60, %62 : vector<8x512xf32>
    %64 = vector.extract_strided_slice %63 {offsets = [0, 0], sizes = [8, 128], strides = [1, 1]} : vector<8x512xf32> to vector<8x128xf32>
    %65 = arith.negf %64 : vector<8x128xf32>
    %66 = math.exp %65 : vector<8x128xf32>
    %cst_33 = arith.constant 1.000000e+00 : f32
    %67 = vector.broadcast %cst_33 : f32 to vector<8x128xf32>
    %68 = arith.addf %67, %66 : vector<8x128xf32>
    %69 = arith.divf %67, %68 : vector<8x128xf32>
    %70 = vector.extract_strided_slice %63 {offsets = [0, 128], sizes = [8, 128], strides = [1, 1]} : vector<8x512xf32> to vector<8x128xf32>
    %71 = arith.negf %70 : vector<8x128xf32>
    %72 = math.exp %71 : vector<8x128xf32>
    %cst_34 = arith.constant 1.000000e+00 : f32
    %73 = vector.broadcast %cst_34 : f32 to vector<8x128xf32>
    %74 = arith.addf %73, %72 : vector<8x128xf32>
    %75 = arith.divf %73, %74 : vector<8x128xf32>
    %76 = vector.extract_strided_slice %63 {offsets = [0, 256], sizes = [8, 128], strides = [1, 1]} : vector<8x512xf32> to vector<8x128xf32>
    %77 = math.tanh %76 : vector<8x128xf32>
    %78 = vector.extract_strided_slice %63 {offsets = [0, 384], sizes = [8, 128], strides = [1, 1]} : vector<8x512xf32> to vector<8x128xf32>
    %79 = arith.negf %78 : vector<8x128xf32>
    %80 = math.exp %79 : vector<8x128xf32>
    %cst_35 = arith.constant 1.000000e+00 : f32
    %81 = vector.broadcast %cst_35 : f32 to vector<8x128xf32>
    %82 = arith.addf %81, %80 : vector<8x128xf32>
    %83 = arith.divf %81, %82 : vector<8x128xf32>
    %84 = arith.mulf %75, %55 : vector<8x128xf32>
    %85 = arith.mulf %69, %77 : vector<8x128xf32>
    %86 = arith.addf %84, %85 : vector<8x128xf32>
    %87 = math.tanh %86 : vector<8x128xf32>
    %88 = arith.mulf %83, %87 : vector<8x128xf32>
    %c1_36 = arith.constant 1 : index
    %c0_37 = arith.constant 0 : index
    %c0_38 = arith.constant 0 : index
    %89 = vector.load %arg14[%c1_36, %c0_37, %c0_38] : memref<3x8x128xf32, #tpu.memory_space<vmem>>, vector<1x8x128xf32>
    %90 = vector.shape_cast %89 : vector<1x8x128xf32> to vector<8x128xf32>
    %91 = vector.shape_cast %88 : vector<8x128xf32> to vector<1x8x128xf32>
    tpu.vector_store %arg14[%c1_36, %c0_37, %c0_38], %91 {strides = array<i32>} : memref<3x8x128xf32, #tpu.memory_space<vmem>>, vector<1x8x128xf32>,
    %c1_39 = arith.constant 1 : index
    %c0_40 = arith.constant 0 : index
    %c0_41 = arith.constant 0 : index
    %92 = vector.load %arg15[%c1_39, %c0_40, %c0_41] : memref<3x8x128xf32, #tpu.memory_space<vmem>>, vector<1x8x128xf32>
    %93 = vector.shape_cast %92 : vector<1x8x128xf32> to vector<8x128xf32>
    %94 = vector.shape_cast %86 : vector<8x128xf32> to vector<1x8x128xf32>
    tpu.vector_store %arg15[%c1_39, %c0_40, %c0_41], %94 {strides = array<i32>} : memref<3x8x128xf32, #tpu.memory_space<vmem>>, vector<1x8x128xf32>,
    %c2 = arith.constant 2 : index
    %c0_42 = arith.constant 0 : index
    %c0_43 = arith.constant 0 : index
    %95 = vector.load %arg3[%c2, %c0_42, %c0_43] : memref<3x8x128xf32, #tpu.memory_space<vmem>>, vector<1x8x128xf32>
    %96 = vector.shape_cast %95 : vector<1x8x128xf32> to vector<8x128xf32>
    %c2_44 = arith.constant 2 : index
    %c0_45 = arith.constant 0 : index
    %c0_46 = arith.constant 0 : index
    %97 = vector.load %arg4[%c2_44, %c0_45, %c0_46] : memref<3x8x128xf32, #tpu.memory_space<vmem>>, vector<1x8x128xf32>
    %98 = vector.shape_cast %97 : vector<1x8x128xf32> to vector<8x128xf32>
    %99 = arith.truncf %88 : vector<8x128xf32> to vector<8x128xbf16>
    %100 = arith.truncf %96 : vector<8x128xf32> to vector<8x128xbf16>
    %101 = tpu.concatenate %99, %100 in 1 : vector<8x128xbf16>, vector<8x128xbf16> -> vector<8x256xbf16>
    %c0_47 = arith.constant 0 : index
    %c0_48 = arith.constant 0 : index
    %102 = vector.load %arg7[%c0_47, %c0_48] : memref<256x512xbf16, #tpu.memory_space<vmem>>, vector<256x512xbf16>
    %cst_49 = arith.constant dense<0.000000e+00> : vector<8x512xf32>
    %103 = tpu.matmul %101, %102, %cst_49 {dimension_numbers = #tpu.dot_dimension_numbers<[1], [0], [0], [1], [0, 0, 1, 1], [], []>} : vector<8x256xbf16>, vector<256x512xbf16>, vector<8x512xf32> -> vector<8x512xf32>
    %c0_50 = arith.constant 0 : index
    %c0_51 = arith.constant 0 : index
    %104 = vector.load %arg10[%c0_50, %c0_51] : memref<1x512xf32, #tpu.memory_space<vmem>>, vector<1x512xf32>
    %105 = vector.broadcast %104 : vector<1x512xf32> to vector<8x512xf32>
    %106 = arith.addf %103, %105 : vector<8x512xf32>
    %107 = vector.extract_strided_slice %106 {offsets = [0, 0], sizes = [8, 128], strides = [1, 1]} : vector<8x512xf32> to vector<8x128xf32>
    %108 = arith.negf %107 : vector<8x128xf32>
    %109 = math.exp %108 : vector<8x128xf32>
    %cst_52 = arith.constant 1.000000e+00 : f32
    %110 = vector.broadcast %cst_52 : f32 to vector<8x128xf32>
    %111 = arith.addf %110, %109 : vector<8x128xf32>
    %112 = arith.divf %110, %111 : vector<8x128xf32>
    %113 = vector.extract_strided_slice %106 {offsets = [0, 128], sizes = [8, 128], strides = [1, 1]} : vector<8x512xf32> to vector<8x128xf32>
    %114 = arith.negf %113 : vector<8x128xf32>
    %115 = math.exp %114 : vector<8x128xf32>
    %cst_53 = arith.constant 1.000000e+00 : f32
    %116 = vector.broadcast %cst_53 : f32 to vector<8x128xf32>
    %117 = arith.addf %116, %115 : vector<8x128xf32>
    %118 = arith.divf %116, %117 : vector<8x128xf32>
    %119 = vector.extract_strided_slice %106 {offsets = [0, 256], sizes = [8, 128], strides = [1, 1]} : vector<8x512xf32> to vector<8x128xf32>
    %120 = math.tanh %119 : vector<8x128xf32>
    %121 = vector.extract_strided_slice %106 {offsets = [0, 384], sizes = [8, 128], strides = [1, 1]} : vector<8x512xf32> to vector<8x128xf32>
    %122 = arith.negf %121 : vector<8x128xf32>
    %123 = math.exp %122 : vector<8x128xf32>
    %cst_54 = arith.constant 1.000000e+00 : f32
    %124 = vector.broadcast %cst_54 : f32 to vector<8x128xf32>
    %125 = arith.addf %124, %123 : vector<8x128xf32>
    %126 = arith.divf %124, %125 : vector<8x128xf32>
    %127 = arith.mulf %118, %98 : vector<8x128xf32>
    %128 = arith.mulf %112, %120 : vector<8x128xf32>
    %129 = arith.addf %127, %128 : vector<8x128xf32>
    %130 = math.tanh %129 : vector<8x128xf32>
    %131 = arith.mulf %126, %130 : vector<8x128xf32>
    %c2_55 = arith.constant 2 : index
    %c0_56 = arith.constant 0 : index
    %c0_57 = arith.constant 0 : index
    %132 = vector.load %arg14[%c2_55, %c0_56, %c0_57] : memref<3x8x128xf32, #tpu.memory_space<vmem>>, vector<1x8x128xf32>
    %133 = vector.shape_cast %132 : vector<1x8x128xf32> to vector<8x128xf32>
    %134 = vector.shape_cast %131 : vector<8x128xf32> to vector<1x8x128xf32>
    tpu.vector_store %arg14[%c2_55, %c0_56, %c0_57], %134 {strides = array<i32>} : memref<3x8x128xf32, #tpu.memory_space<vmem>>, vector<1x8x128xf32>,
    %c2_58 = arith.constant 2 : index
    %c0_59 = arith.constant 0 : index
    %c0_60 = arith.constant 0 : index
    %135 = vector.load %arg15[%c2_58, %c0_59, %c0_60] : memref<3x8x128xf32, #tpu.memory_space<vmem>>, vector<1x8x128xf32>
    %136 = vector.shape_cast %135 : vector<1x8x128xf32> to vector<8x128xf32>
    %137 = vector.shape_cast %129 : vector<8x128xf32> to vector<1x8x128xf32>
    tpu.vector_store %arg15[%c2_58, %c0_59, %c0_60], %137 {strides = array<i32>} : memref<3x8x128xf32, #tpu.memory_space<vmem>>, vector<1x8x128xf32>,
    %138 = arith.truncf %131 : vector<8x128xf32> to vector<8x128xbf16>
    %c0_61 = arith.constant 0 : index
    %c0_62 = arith.constant 0 : index
    %139 = vector.load %arg11[%c0_61, %c0_62] : memref<128x128xbf16, #tpu.memory_space<vmem>>, vector<128x128xbf16>
    %cst_63 = arith.constant dense<0.000000e+00> : vector<8x128xf32>
    %140 = tpu.matmul %138, %139, %cst_63 {dimension_numbers = #tpu.dot_dimension_numbers<[1], [0], [0], [1], [0, 0, 1, 1], [], []>} : vector<8x128xbf16>, vector<128x128xbf16>, vector<8x128xf32> -> vector<8x128xf32>
    %c0_64 = arith.constant 0 : index
    %c0_65 = arith.constant 0 : index
    %141 = vector.load %arg12[%c0_64, %c0_65] : memref<1x128xf32, #tpu.memory_space<vmem>>, vector<1x128xf32>
    %142 = vector.broadcast %141 : vector<1x128xf32> to vector<8x128xf32>
    %143 = arith.addf %140, %142 : vector<8x128xf32>
    %c0_66 = arith.constant 0 : index
    %c0_67 = arith.constant 0 : index
    %144 = vector.load %arg13[%c0_66, %c0_67] : memref<8x128xf32, #tpu.memory_space<vmem>>, vector<8x128xf32>
    tpu.vector_store %arg13[%c0_66, %c0_67], %143 {strides = array<i32>} : memref<8x128xf32, #tpu.memory_space<vmem>>, vector<8x128xf32>,
    return
  }
  func.func @transform_0(%arg0: i32) -> (i32, i32) {
    %c0_i32 = arith.constant 0 : i32
    %c0_i32_0 = arith.constant 0 : i32
    %c0_i32_1 = arith.constant 0 : i32
    return %c0_i32, %c0_i32_0 : i32, i32
  }
  func.func @transform_1(%arg0: i32) -> (i32, i32) {
    %c0_i32 = arith.constant 0 : i32
    %c0_i32_0 = arith.constant 0 : i32
    %c0_i32_1 = arith.constant 0 : i32
    return %c0_i32, %c0_i32_0 : i32, i32
  }
  func.func @transform_2(%arg0: i32) -> (i32, i32, i32) {
    %c0_i32 = arith.constant 0 : i32
    %c0_i32_0 = arith.constant 0 : i32
    %c0_i32_1 = arith.constant 0 : i32
    %c0_i32_2 = arith.constant 0 : i32
    return %c0_i32, %c0_i32_0, %c0_i32_1 : i32, i32, i32
  }
  func.func @transform_3(%arg0: i32) -> (i32, i32, i32) {
    %c0_i32 = arith.constant 0 : i32
    %c0_i32_0 = arith.constant 0 : i32
    %c0_i32_1 = arith.constant 0 : i32
    %c0_i32_2 = arith.constant 0 : i32
    return %c0_i32, %c0_i32_0, %c0_i32_1 : i32, i32, i32
  }
  func.func @transform_4(%arg0: i32) -> (i32, i32) {
    %c0_i32 = arith.constant 0 : i32
    %c0_i32_0 = arith.constant 0 : i32
    %c0_i32_1 = arith.constant 0 : i32
    return %c0_i32, %c0_i32_0 : i32, i32
  }
  func.func @transform_5(%arg0: i32) -> (i32, i32) {
    %c0_i32 = arith.constant 0 : i32
    %c0_i32_0 = arith.constant 0 : i32
    %c0_i32_1 = arith.constant 0 : i32
    return %c0_i32, %c0_i32_0 : i32, i32
  }
  func.func @transform_6(%arg0: i32) -> (i32, i32) {
    %c0_i32 = arith.constant 0 : i32
    %c0_i32_0 = arith.constant 0 : i32
    %c0_i32_1 = arith.constant 0 : i32
    return %c0_i32, %c0_i32_0 : i32, i32
  }
  func.func @transform_7(%arg0: i32) -> (i32, i32) {
    %c0_i32 = arith.constant 0 : i32
    %c0_i32_0 = arith.constant 0 : i32
    %c0_i32_1 = arith.constant 0 : i32
    return %c0_i32, %c0_i32_0 : i32, i32
  }
  func.func @transform_8(%arg0: i32) -> (i32, i32) {
    %c0_i32 = arith.constant 0 : i32
    %c0_i32_0 = arith.constant 0 : i32
    %c0_i32_1 = arith.constant 0 : i32
    return %c0_i32, %c0_i32_0 : i32, i32
  }
  func.func @transform_9(%arg0: i32) -> (i32, i32) {
    %c0_i32 = arith.constant 0 : i32
    %c0_i32_0 = arith.constant 0 : i32
    %c0_i32_1 = arith.constant 0 : i32
    return %c0_i32, %c0_i32_0 : i32, i32
  }
  func.func @transform_10(%arg0: i32) -> (i32, i32) {
    %c0_i32 = arith.constant 0 : i32
    %c0_i32_0 = arith.constant 0 : i32
    %c0_i32_1 = arith.constant 0 : i32
    return %c0_i32, %c0_i32_0 : i32, i32
  }
  func.func @transform_11(%arg0: i32) -> (i32, i32) {
    %c0_i32 = arith.constant 0 : i32
    %c0_i32_0 = arith.constant 0 : i32
    %c0_i32_1 = arith.constant 0 : i32
    return %c0_i32, %c0_i32_0 : i32, i32
  }
  func.func @transform_12(%arg0: i32) -> (i32, i32) {
    %c0_i32 = arith.constant 0 : i32
    %c0_i32_0 = arith.constant 0 : i32
    %c0_i32_1 = arith.constant 0 : i32
    return %c0_i32, %c0_i32_0 : i32, i32
  }
  func.func @transform_13(%arg0: i32) -> (i32, i32, i32) {
    %c0_i32 = arith.constant 0 : i32
    %c0_i32_0 = arith.constant 0 : i32
    %c0_i32_1 = arith.constant 0 : i32
    %c0_i32_2 = arith.constant 0 : i32
    return %c0_i32, %c0_i32_0, %c0_i32_1 : i32, i32, i32
  }
  func.func @transform_14(%arg0: i32) -> (i32, i32, i32) {
    %c0_i32 = arith.constant 0 : i32
    %c0_i32_0 = arith.constant 0 : i32
    %c0_i32_1 = arith.constant 0 : i32
    %c0_i32_2 = arith.constant 0 : i32
    return %c0_i32, %c0_i32_0, %c0_i32_1 : i32, i32, i32
  }
}

</mosaic_0001>

<bundles_post_ra>
// kernel: tpu_custom_call.1
= control target key start
LH: loop header
LB: loop body
LE: loop exit
PB: predicated region body
PF: predicated region fallthrough
CT: control target
= control target key end

     0   :  { %20 = vsyncpa [#allocation3], 0  ;;  %s3177_s0 = inlined_call_operand.vmem [shape: s32[8,1], index: 0, kind: input, shape index: {}]   ;;  %s3178_s1 = inlined_call_operand.hbm [shape: bf16[128,128], index: 1, kind: input, shape index: {}]   ;;  %s3179_s2 = inlined_call_operand.hbm [shape: f32[3,8,128], index: 2, kind: input, shape index: {}]   ;;  %s3180_s3 = inlined_call_operand.hbm [shape: f32[3,8,128], index: 3, kind: input, shape index: {}]   ;;  %s3181_s4 = inlined_call_operand.hbm [shape: bf16[256,512], index: 4, kind: input, shape index: {}]   ;;  %s3182_s5 = inlined_call_operand.hbm [shape: bf16[256,512], index: 5, kind: input, shape index: {}]   ;;  %s3183_s6 = inlined_call_operand.hbm [shape: bf16[256,512], index: 6, kind: input, shape index: {}]   ;;  %s3184_s7 = inlined_call_operand.vmem [shape: f32[1,512], index: 7, kind: input, shape index: {}]   ;;  %s3185_s8 = inlined_call_operand.vmem [shape: f32[1,512], index: 8, kind: input, shape index: {}]   ;;  %s3186_s9 = inlined_call_operand.vmem [shape: f32[1,512], index: 9, kind: input, shape index: {}]   ;;  %s3187_s10 = inlined_call_operand.hbm [shape: bf16[128,128], index: 10, kind: input, shape index: {}]   ;;  %s3188_s11 = inlined_call_operand.vmem [shape: f32[1,128], index: 11, kind: input, shape index: {}]   ;;  %s3189_s12 = inlined_call_operand.hbm [shape: f32[8,128], index: 12, kind: output, shape index: {0}]   ;;  %s3190_s13 = inlined_call_operand.hbm [shape: f32[3,8,128], index: 13, kind: output, shape index: {1}]   ;;  %s3191_s14 = inlined_call_operand.hbm [shape: f32[3,8,128], index: 14, kind: output, shape index: {2}]  }
   0x1   :  { %21 = vsyncpa [#allocation6], 0 }
   0x2   :  { %22 = vsyncpa [#allocation9], 0 }
   0x3   :  { %23 = vsyncpa [#allocation12], 0 }
   0x4   :  { %24 = vsyncpa [#allocation4], 0 }
   0x5   :  { %25 = vsyncpa [#allocation16], 0  ;;  %s2864_s29 = smov [#allocation5]   ;;  %s2632_s17 = scalar_lea.hbm %s3179_s2, 384 }
   0x6   :  { %s45_s30 = sshll.u32 %s2864_s29, 4  ;;  %p2633_p0 = scmp.ne.s32.totalorder %s3179_s2, %s2632_s17  ;;  %s46_s30 = int_to_ptr.vmem [resolvable:$true] %s45_s30 }
   0x7   :  { %p2636_p1 = scmp.lt.u32.totalorder %s2632_s17, %s3179_s2 }
   0x9   :  { %p2638_p2 = pnand %p2636_p1, %p2633_p0 }
   0xb   :  { %2641 = shalt.err (!%p2638_p2)
}
   0xc   :  { %s2642_s22 = scalar_lea.vmem %s46_s30, 384  ;;  %p2647_p4 = scmp.lt.s32.totalorder %s46_s30, %s46_s30 }
   0xd   :  { %p2643_p3 = scmp.ne.s32.totalorder %s46_s30, %s2642_s22  ;;  %p2648_p5 = scmp.lt.s32.totalorder %s2642_s22, %s2642_s22 }
   0xf   :  { %p2649_p6 = por %p2648_p5, %p2647_p4 }
  0x11   :  { %p2650_p7 = pnand %p2649_p6, %p2643_p3 }
  0x13   :  { %2653 = shalt.err (!%p2650_p7)
}
  0x14   :  { %s3192_s23 = smov 128   ;;  %s2866_s24 = smov 8  }
  0x15   :  { %51 = dma.hbm_to_vmem [thread:$0]  %s3179_s2, 384, %s46_s30, [#allocation6], %s3192_s23, %s3192_s23, %s2866_s24  }
  0x16   :  { %s2867_s27 = smov [#allocation8]   ;;  %s2654_s16 = scalar_lea.hbm %s3181_s4, 8192 }
  0x17   :  { %s69_s28 = sshll.u32 %s2867_s27, 4  ;;  %p2655_p8 = scmp.ne.s32.totalorder %s3181_s4, %s2654_s16  ;;  %s70_s28 = int_to_ptr.vmem [resolvable:$true] %s69_s28 }
  0x18   :  { %p2658_p9 = scmp.lt.u32.totalorder %s2654_s16, %s3181_s4 }
  0x1a   :  { %p2660_p10 = pnand %p2658_p9, %p2655_p8 }
  0x1c   :  { %2663 = shalt.err (!%p2660_p10)
}
  0x1d   :  { %s2664_s21 = scalar_lea.vmem %s70_s28, 8192  ;;  %p2669_p12 = scmp.lt.s32.totalorder %s70_s28, %s70_s28 }
  0x1e   :  { %p2665_p11 = scmp.ne.s32.totalorder %s70_s28, %s2664_s21  ;;  %p2670_p13 = scmp.lt.s32.totalorder %s2664_s21, %s2664_s21 }
  0x20   :  { %p2671_p0 = por %p2670_p13, %p2669_p12 }
  0x22   :  { %p2672_p1 = pnand %p2671_p0, %p2665_p11 }
  0x24   :  { %2675 = shalt.err (!%p2672_p1)
}
  0x25   :  { %s2868_s2 = smov 256   ;;  %s2869_s30 = smov 16  }
  0x26   :  { %75 = dma.hbm_to_vmem [thread:$0]  %s3181_s4, 8192, %s70_s28, [#allocation9], %s2868_s2, %s2868_s2, %s2869_s30  }
  0x27   :  { %s2870_s26 = smov [#allocation11]   ;;  %s2871_s29 = smov [#allocation2]  }
  0x28   :  { %s93_s27 = sshll.u32 %s2870_s26, 4  ;;  %s33_s15 = sshll.u32 %s2871_s29, 4  ;;  %s94_s27 = int_to_ptr.vmem [resolvable:$true] %s93_s27  ;;  %s2989_s15 = int_to_ptr.vmem [resolvable:$true] %s33_s15 }
  0x29   :  { %s2676_s18 = scalar_lea.hbm %s3183_s6, 8192 }
  0x2a   :  { %p2677_p2 = scmp.ne.s32.totalorder %s3183_s6, %s2676_s18  ;;  %p2680_p3 = scmp.lt.u32.totalorder %s2676_s18, %s3183_s6 }
  0x2c   :  { %p2682_p4 = pnand %p2680_p3, %p2677_p2 }
  0x2e   :  { %2685 = shalt.err (!%p2682_p4)
}
  0x2f   :  { %s2686_s4 = scalar_lea.vmem %s94_s27, 8192  ;;  %p2691_p6 = scmp.lt.s32.totalorder %s94_s27, %s94_s27 }
  0x30   :  { %p2687_p5 = scmp.ne.s32.totalorder %s94_s27, %s2686_s4  ;;  %p2692_p7 = scmp.lt.s32.totalorder %s2686_s4, %s2686_s4 }
  0x32   :  { %p2693_p8 = por %p2692_p7, %p2691_p6 }
  0x34   :  { %p2694_p9 = pnand %p2693_p8, %p2687_p5 }
  0x36   :  { %2697 = shalt.err (!%p2694_p9)
}
  0x37   :  { %99 = dma.hbm_to_vmem [thread:$0]  %s3183_s6, 8192, %s94_s27, [#allocation12], %s2868_s2, %s2868_s2, %s2869_s30  }
  0x38   :  { %s2698_s23 = scalar_lea.hbm %s3178_s1, 1024 }
  0x39   :  { %p2699_p10 = scmp.ne.s32.totalorder %s3178_s1, %s2698_s23  ;;  %p2702_p11 = scmp.lt.u32.totalorder %s2698_s23, %s3178_s1 }
  0x3b   :  { %p2704_p12 = pnand %p2702_p11, %p2699_p10 }
  0x3d   :  { %2707 = shalt.err (!%p2704_p12)
}
  0x3e   :  { %s2708_s19 = scalar_lea.vmem %s2989_s15, 1024  ;;  %p2713_p0 = scmp.lt.s32.totalorder %s2989_s15, %s2989_s15 }
  0x3f   :  { %p2709_p13 = scmp.ne.s32.totalorder %s2989_s15, %s2708_s19  ;;  %p2714_p1 = scmp.lt.s32.totalorder %s2708_s19, %s2708_s19 }
  0x41   :  { %p2715_p2 = por %p2714_p1, %p2713_p0 }
  0x43   :  { %p2716_p3 = pnand %p2715_p2, %p2709_p13 }
  0x45   :  { %2719 = shalt.err (!%p2716_p3)
}
  0x46   :  { %s2872_s6 = smov 64   ;;  %s2873_s27 = smov 4  }
  0x47   :  { %39 = dma.hbm_to_vmem [thread:$0]  %s3178_s1, 1024, %s2989_s15, [#allocation3], %s2872_s6, %s2872_s6, %s2873_s27  }
  0x48   :  { %s2874_s4 = smov [#allocation7]   ;;  %s2875_s22 = smov [#allocation10]  }
  0x49   :  { %s57_s28 = sshll.u32 %s2874_s4, 4  ;;  %s81_s25 = sshll.u32 %s2875_s22, 4  ;;  %s58_s28 = int_to_ptr.vmem [resolvable:$true] %s57_s28  ;;  %s3026_s25 = int_to_ptr.vmem [resolvable:$true] %s81_s25 }
  0x4a   :  { %s2720_s29 = scalar_lea.hbm %s3180_s3, 384 }
  0x4b   :  { %p2721_p4 = scmp.ne.s32.totalorder %s3180_s3, %s2720_s29  ;;  %p2724_p5 = scmp.lt.u32.totalorder %s2720_s29, %s3180_s3 }
  0x4d   :  { %p2726_p6 = pnand %p2724_p5, %p2721_p4 }
  0x4f   :  { %2729 = shalt.err (!%p2726_p6)
}
  0x50   :  { %s2730_s1 = scalar_lea.vmem %s58_s28, 384  ;;  %p2735_p8 = scmp.lt.s32.totalorder %s58_s28, %s58_s28 }
  0x51   :  { %p2731_p7 = scmp.ne.s32.totalorder %s58_s28, %s2730_s1  ;;  %p2736_p9 = scmp.lt.s32.totalorder %s2730_s1, %s2730_s1 }
  0x53   :  { %p2737_p10 = por %p2736_p9, %p2735_p8 }
  0x55   :  { %p2738_p11 = pnand %p2737_p10, %p2731_p7 }
  0x57   :  { %2741 = shalt.err (!%p2738_p11)
}
  0x58   :  { %s3194_s15 = smov 128   ;;  %s2742_s26 = scalar_lea.hbm %s3182_s5, 8192 }
  0x59   :  { %63 = dma.hbm_to_vmem [thread:$0]  %s3180_s3, 384, %s58_s28, [#allocation6], %s3194_s15, %s3194_s15, %s2866_s24  }
  0x5a   :  { %p2743_p12 = scmp.ne.s32.totalorder %s3182_s5, %s2742_s26  ;;  %p2746_p13 = scmp.lt.u32.totalorder %s2742_s26, %s3182_s5 }
  0x5c   :  { %p2748_p0 = pnand %p2746_p13, %p2743_p12 }
  0x5e   :  { %2751 = shalt.err (!%p2748_p0)
}
  0x5f   :  { %s2752_s18 = scalar_lea.vmem %s3026_s25, 8192  ;;  %p2757_p2 = scmp.lt.s32.totalorder %s3026_s25, %s3026_s25 }
  0x60   :  { %p2753_p1 = scmp.ne.s32.totalorder %s3026_s25, %s2752_s18  ;;  %p2758_p3 = scmp.lt.s32.totalorder %s2752_s18, %s2752_s18 }
  0x62   :  { %p2759_p4 = por %p2758_p3, %p2757_p2 }
  0x64   :  { %p2760_p5 = pnand %p2759_p4, %p2753_p1 }
  0x66   :  { %2763 = shalt.err (!%p2760_p5)
}
  0x67   :  { %87 = dma.hbm_to_vmem [thread:$0]  %s3182_s5, 8192, %s3026_s25, [#allocation9], %s2868_s2, %s2868_s2, %s2869_s30  }
  0x68   :  { %s2876_s19 = smov [#allocation13]   ;;  %s2764_s4 = scalar_lea.hbm %s3187_s10, 1024 }
  0x69   :  { %s111_s1 = sshll.u32 %s2876_s19, 4  ;;  %p2765_p6 = scmp.ne.s32.totalorder %s3187_s10, %s2764_s4  ;;  %s112_s1 = int_to_ptr.vmem [resolvable:$true] %s111_s1 }
  0x6a   :  { %p2768_p7 = scmp.lt.u32.totalorder %s2764_s4, %s3187_s10 }
  0x6c   :  { %p2770_p8 = pnand %p2768_p7, %p2765_p6 }
  0x6e   :  { %2773 = shalt.err (!%p2770_p8)
}
  0x6f   :  { %s2774_s16 = scalar_lea.vmem %s112_s1, 1024  ;;  %p2779_p10 = scmp.lt.s32.totalorder %s112_s1, %s112_s1 }
  0x70   :  { %p2775_p9 = scmp.ne.s32.totalorder %s112_s1, %s2774_s16  ;;  %p2780_p11 = scmp.lt.s32.totalorder %s2774_s16, %s2774_s16 }
  0x72   :  { %p2781_p12 = por %p2780_p11, %p2779_p10 }
  0x74   :  { %p2782_p13 = pnand %p2781_p12, %p2775_p9 }
  0x76   :  { %2785 = shalt.err (!%p2782_p13)
}
  0x77   :  { %117 = dma.hbm_to_vmem [thread:$0]  %s3187_s10, 1024, %s112_s1, [#allocation12], %s2872_s6, %s2872_s6, %s2873_s27  }
  0x78   :  { %2852 = dma.done.wait [#allocation3], 1024  }
  0x79   :  { %2853 = vsyncadd [#allocation3], 4294966272 }
  0x7a   :  { %2854 = dma.done.wait [#allocation6], 768  }
  0x7b   :  { %2855 = vsyncadd [#allocation6], 4294966528 }
  0x7c   :  { %2856 = dma.done.wait [#allocation9], 16384  }
  0x7d   :  { %2857 = vsyncadd [#allocation9], 4294950912 }
  0x7e   :  { %2858 = dma.done.wait [#allocation12], 9216  }
  0x7f   :  { %2859 = vsyncadd [#allocation12], 4294958080  ;;  %v2877_v0 = vmov 0   ;;  %v2878_v1 = vmov 0.0   ;;  %v142_v2 = vld [vmem:[%s3177_s0] sm:$0xff]  ;;  %v2280_v3 = vld [vmem:[#allocation2] sm:$0xff]   ;;  %v143_v43 = vlaneseq }
  0x80   :  { %2279 = vset.pattern.permute.xlu0 %v2877_v0  ;;  %2219 = vmatprep.subr.bf16.mxu0 %v2878_v1  ;;  %vm2879_vm0 = vmmov 0   ;;  %v2281_v4 = vld [vmem:[#allocation2 + $0x8] sm:$0xff]   ;;  %v2282_v5 = vld [vmem:[#allocation2 + $0x10] sm:$0xff]   ;;  %v2283_v7 = vld [vmem:[#allocation2 + $0x18] sm:$0xff]   ;;  %v2880_v48 = vmov 1.0|1.0  }
  0x81   :  { %146 = vperm.xlu0 %2279, %v142_v2   ;;  %2235 = vmatprep.mubr.msk.bf16.mxu0 %vm2879_vm0, %v2878_v1  ;;  %v2288_v6 = vld [vmem:[#allocation8 + $0x4] ss:$16 sps:$4 sm:$0xff]   ;;  %v2293_v8 = vld [vmem:[#allocation8] ss:$16 sps:$4 sm:$0xff]   ;;  %v2285_v15 = vld [vmem:[#allocation2 + $0x28] sm:$0xff]   ;;  %v144_v44 = vand.u32 127, %v143_v43 }
  0x82   :  { %2220 = vmatpush3.bf16.msra.mxu0 %v2280_v3  ;;  %666 = vmatprep.subr.bf16.mxu1 %v2288_v6  ;;  %v2294_v9 = vld [vmem:[#allocation8 + $0x24] ss:$16 sps:$4 sm:$0xff]   ;;  %v2299_v10 = vld [vmem:[#allocation8 + $0x20] ss:$16 sps:$4 sm:$0xff]   ;;  %v2287_v21 = vld [vmem:[#allocation2 + $0x38] sm:$0xff]  }
  0x83   :  { %2221 = vmatprep.subr.bf16.mxu0 %v2878_v1  ;;  %667 = vmatpush1.bf16.msra.mxu1 %v2293_v8  ;;  %v2300_v11 = vld [vmem:[#allocation8 + $0x44] ss:$16 sps:$4 sm:$0xff]   ;;  %v2305_v13 = vld [vmem:[#allocation8 + $0x40] ss:$16 sps:$4 sm:$0xff]   ;;  %v2292_v22 = vld [vmem:[#allocation8 + $0xc] ss:$16 sps:$4 sm:$0xff]  }
  0x84   :  { %668 = vmatprep.subr.bf16.mxu1 %v2294_v9  ;;  %v2284_v12 = vld [vmem:[#allocation2 + $0x20] sm:$0xff]   ;;  %v2286_v18 = vld [vmem:[#allocation2 + $0x30] sm:$0xff]   ;;  %v2290_v46 = vld [vmem:[#allocation8 + $0x8] ss:$16 sps:$4 sm:$0xff]  }
  0x85   :  { %v2306_v14 = vld [vmem:[#allocation8 + $0x64] ss:$16 sps:$4 sm:$0xff]   ;;  %v2311_v16 = vld [vmem:[#allocation8 + $0x60] ss:$16 sps:$4 sm:$0xff]   ;;  %v2298_v47 = vld [vmem:[#allocation8 + $0x2c] ss:$16 sps:$4 sm:$0xff]  }
  0x86   :  { %2222 = vmatpush3.bf16.msra.mxu0 %v2281_v4  ;;  %v2312_v17 = vld [vmem:[#allocation8 + $0x84] ss:$16 sps:$4 sm:$0xff]   ;;  %v2317_v19 = vld [vmem:[#allocation8 + $0x80] ss:$16 sps:$4 sm:$0xff]   ;;  %v2296_v49 = vld [vmem:[#allocation8 + $0x28] ss:$16 sps:$4 sm:$0xff]  }
  0x87   :  { %2223 = vmatprep.subr.bf16.mxu0 %v2878_v1  ;;  %669 = vmatpush1.bf16.msra.mxu1 %v2299_v10  ;;  %v2318_v20 = vld [vmem:[#allocation8 + $0xa4] ss:$16 sps:$4 sm:$0xff]   ;;  %v2323_v23 = vld [vmem:[#allocation8 + $0xa0] ss:$16 sps:$4 sm:$0xff]   ;;  %v2304_v50 = vld [vmem:[#allocation8 + $0x4c] ss:$16 sps:$4 sm:$0xff]  }
  0x88   :  { %670 = vmatprep.subr.bf16.mxu1 %v2300_v11  ;;  %v2324_v24 = vld [vmem:[#allocation8 + $0xc4] ss:$16 sps:$4 sm:$0xff]   ;;  %v2329_v25 = vld [vmem:[#allocation8 + $0xc0] ss:$16 sps:$4 sm:$0xff]   ;;  %v2302_v51 = vld [vmem:[#allocation8 + $0x48] ss:$16 sps:$4 sm:$0xff]  }
  0x89   :  { %v2330_v26 = vld [vmem:[#allocation8 + $0xe4] ss:$16 sps:$4 sm:$0xff]   ;;  %v2335_v27 = vld [vmem:[#allocation8 + $0xe0] ss:$16 sps:$4 sm:$0xff]   ;;  %v2310_v52 = vld [vmem:[#allocation8 + $0x6c] ss:$16 sps:$4 sm:$0xff]  }
  0x8a   :  { %2224 = vmatpush3.bf16.msra.mxu0 %v2282_v5  ;;  %v2336_v28 = vld [vmem:[#allocation8 + $0x104] ss:$16 sps:$4 sm:$0xff]   ;;  %v2341_v29 = vld [vmem:[#allocation8 + $0x100] ss:$16 sps:$4 sm:$0xff]   ;;  %v2308_v53 = vld [vmem:[#allocation8 + $0x68] ss:$16 sps:$4 sm:$0xff]  }
  0x8b   :  { %2225 = vmatprep.subr.bf16.mxu0 %v2878_v1  ;;  %671 = vmatpush1.bf16.msra.mxu1 %v2305_v13  ;;  %v2342_v30 = vld [vmem:[#allocation8 + $0x124] ss:$16 sps:$4 sm:$0xff]   ;;  %v2347_v31 = vld [vmem:[#allocation8 + $0x120] ss:$16 sps:$4 sm:$0xff]   ;;  %v2316_v54 = vld [vmem:[#allocation8 + $0x8c] ss:$16 sps:$4 sm:$0xff]  }
  0x8c   :  { %672 = vmatprep.subr.bf16.mxu1 %v2306_v14  ;;  %v2348_v32 = vld [vmem:[#allocation8 + $0x144] ss:$16 sps:$4 sm:$0xff]   ;;  %v2353_v33 = vld [vmem:[#allocation8 + $0x140] ss:$16 sps:$4 sm:$0xff]   ;;  %v2314_v55 = vld [vmem:[#allocation8 + $0x88] ss:$16 sps:$4 sm:$0xff]  }
  0x8d   :  { %v2354_v34 = vld [vmem:[#allocation8 + $0x164] ss:$16 sps:$4 sm:$0xff]   ;;  %v2359_v35 = vld [vmem:[#allocation8 + $0x160] ss:$16 sps:$4 sm:$0xff]   ;;  %v2322_v56 = vld [vmem:[#allocation8 + $0xac] ss:$16 sps:$4 sm:$0xff]  }
  0x8e   :  { %2226 = vmatpush3.bf16.msra.mxu0 %v2283_v7  ;;  %v2360_v36 = vld [vmem:[#allocation8 + $0x184] ss:$16 sps:$4 sm:$0xff]   ;;  %v2365_v37 = vld [vmem:[#allocation8 + $0x180] ss:$16 sps:$4 sm:$0xff]   ;;  %v2320_v57 = vld [vmem:[#allocation8 + $0xa8] ss:$16 sps:$4 sm:$0xff]  }
  0x8f   :  { %2227 = vmatprep.subr.bf16.mxu0 %v2878_v1  ;;  %673 = vmatpush1.bf16.msra.mxu1 %v2311_v16  ;;  %v2366_v38 = vld [vmem:[#allocation8 + $0x1a4] ss:$16 sps:$4 sm:$0xff]   ;;  %v2371_v39 = vld [vmem:[#allocation8 + $0x1a0] ss:$16 sps:$4 sm:$0xff]   ;;  %v2328_v58 = vld [vmem:[#allocation8 + $0xcc] ss:$16 sps:$4 sm:$0xff]  }
  0x90   :  { %674 = vmatprep.subr.bf16.mxu1 %v2312_v17  ;;  %v2372_v40 = vld [vmem:[#allocation8 + $0x1c4] ss:$16 sps:$4 sm:$0xff]   ;;  %v2377_v41 = vld [vmem:[#allocation8 + $0x1c0] ss:$16 sps:$4 sm:$0xff]   ;;  %v2326_v59 = vld [vmem:[#allocation8 + $0xc8] ss:$16 sps:$4 sm:$0xff]  }
  0x91   :  { %v2378_v42 = vld [vmem:[#allocation8 + $0x1e4] ss:$16 sps:$4 sm:$0xff]   ;;  %v2334_v60 = vld [vmem:[#allocation8 + $0xec] ss:$16 sps:$4 sm:$0xff]   ;;  %v2332_v61 = vld [vmem:[#allocation8 + $0xe8] ss:$16 sps:$4 sm:$0xff]  }
  0x92   :  { %2228 = vmatpush3.bf16.msra.mxu0 %v2284_v12  ;;  %v2340_v62 = vld [vmem:[#allocation8 + $0x10c] ss:$16 sps:$4 sm:$0xff]   ;;  %v2338_v63 = vld [vmem:[#allocation8 + $0x108] ss:$16 sps:$4 sm:$0xff]   ;;  %v256_v16 = vld [vmem:[#allocation5] sm:$0xff] }
  0x93   :  { %2229 = vmatprep.subr.bf16.mxu0 %v2878_v1  ;;  %675 = vmatpush1.bf16.msra.mxu1 %v2317_v19  ;;  %v2346_v0 = vld [vmem:[#allocation8 + $0x12c] ss:$16 sps:$4 sm:$0xff]   ;;  %v2344_v2 = vld [vmem:[#allocation8 + $0x128] ss:$16 sps:$4 sm:$0xff]   ;;  %v259_v17 = vpack.c.bf16 %v256_v16, %v256_v16 }
  0x94   :  { %676 = vmatprep.subr.bf16.mxu1 %v2318_v20  ;;  %v2352_v3 = vld [vmem:[#allocation8 + $0x14c] ss:$16 sps:$4 sm:$0xff]   ;;  %v2350_v4 = vld [vmem:[#allocation8 + $0x148] ss:$16 sps:$4 sm:$0xff]  }
  0x95   :  { %v2358_v5 = vld [vmem:[#allocation8 + $0x16c] ss:$16 sps:$4 sm:$0xff]   ;;  %v2356_v6 = vld [vmem:[#allocation8 + $0x168] ss:$16 sps:$4 sm:$0xff]   ;;  %698 = vmatprep.mubr.bf16.mxu1 %v259_v17 }
  0x96   :  { %2230 = vmatpush3.bf16.msra.mxu0 %v2285_v15  ;;  %v2364_v7 = vld [vmem:[#allocation8 + $0x18c] ss:$16 sps:$4 sm:$0xff]   ;;  %v2362_v8 = vld [vmem:[#allocation8 + $0x188] ss:$16 sps:$4 sm:$0xff]   ;;  %v2383_v15 = vld [vmem:[#allocation8 + $0x1e0] ss:$16 sps:$4 sm:$0xff]  }
  0x97   :  { %2231 = vmatprep.subr.bf16.mxu0 %v2878_v1  ;;  %677 = vmatpush1.bf16.msra.mxu1 %v2323_v23  ;;  %v2370_v9 = vld [vmem:[#allocation8 + $0x1ac] ss:$16 sps:$4 sm:$0xff]   ;;  %v2368_v10 = vld [vmem:[#allocation8 + $0x1a8] ss:$16 sps:$4 sm:$0xff]  }
  0x98   :  { %678 = vmatprep.subr.bf16.mxu1 %v2324_v24  ;;  %v2376_v11 = vld [vmem:[#allocation8 + $0x1cc] ss:$16 sps:$4 sm:$0xff]   ;;  %v2374_v12 = vld [vmem:[#allocation8 + $0x1c8] ss:$16 sps:$4 sm:$0xff]  }
  0x99   :  { %v2382_v13 = vld [vmem:[#allocation8 + $0x1ec] ss:$16 sps:$4 sm:$0xff]   ;;  %v2380_v14 = vld [vmem:[#allocation8 + $0x1e8] ss:$16 sps:$4 sm:$0xff]  }
  0x9a   :  { %2232 = vmatpush3.bf16.msra.mxu0 %v2286_v18  ;;  %v2386_v18 = vld [vmem:[#allocation10 + $0x4] ss:$16 sps:$4 sm:$0xff]   ;;  %v2389_v19 = vld [vmem:[#allocation10 + $0xc] ss:$16 sps:$4 sm:$0xff]  }
  0x9b   :  { %2233 = vmatprep.subr.bf16.mxu0 %v2878_v1  ;;  %679 = vmatpush1.bf16.msra.mxu1 %v2329_v25  ;;  %v2392_v25 = vld [vmem:[#allocation10 + $0x24] ss:$16 sps:$4 sm:$0xff]   ;;  %v2467_v16 = vld [vmem:[#allocation10 + $0x1ac] ss:$16 sps:$4 sm:$0xff]  }
  0x9c   :  { %680 = vmatprep.subr.bf16.mxu1 %v2330_v26  ;;  %v2395_v26 = vld [vmem:[#allocation10 + $0x2c] ss:$16 sps:$4 sm:$0xff]  }
  0x9e   :  { %2234 = vmatpush3.bf16.msra.mxu0 %v2287_v21  ;;  %v2384_v21 = vld [vmem:[#allocation10] ss:$16 sps:$4 sm:$0xff]  }
  0x9f   :  { %707 = vmatprep.subr.bf16.mxu0 %v2292_v22  ;;  %681 = vmatpush1.bf16.msra.mxu1 %v2335_v27  ;;  %v2387_v22 = vld [vmem:[#allocation10 + $0x8] ss:$16 sps:$4 sm:$0xff]  }
  0xa0   :  { %682 = vmatprep.subr.bf16.mxu1 %v2336_v28 }
  0xa3   :  { %683 = vmatpush1.bf16.msra.mxu1 %v2341_v29  ;;  %v2390_v29 = vld [vmem:[#allocation10 + $0x20] ss:$16 sps:$4 sm:$0xff]  }
  0xa4   :  { %684 = vmatprep.subr.bf16.mxu1 %v2342_v30  ;;  %v2393_v30 = vld [vmem:[#allocation10 + $0x28] ss:$16 sps:$4 sm:$0xff]  }
  0xa7   :  { %685 = vmatpush1.bf16.msra.mxu1 %v2347_v31  ;;  %v2398_v31 = vld [vmem:[#allocation10 + $0x44] ss:$16 sps:$4 sm:$0xff]  }
  0xa8   :  { %686 = vmatprep.subr.bf16.mxu1 %v2348_v32  ;;  %v2401_v32 = vld [vmem:[#allocation10 + $0x4c] ss:$16 sps:$4 sm:$0xff]  }
  0xab   :  { %687 = vmatpush1.bf16.msra.mxu1 %v2353_v33  ;;  %v2396_v33 = vld [vmem:[#allocation10 + $0x40] ss:$16 sps:$4 sm:$0xff]  }
  0xac   :  { %688 = vmatprep.subr.bf16.mxu1 %v2354_v34  ;;  %v2399_v34 = vld [vmem:[#allocation10 + $0x48] ss:$16 sps:$4 sm:$0xff]  }
  0xaf   :  { %689 = vmatpush1.bf16.msra.mxu1 %v2359_v35  ;;  %v2404_v35 = vld [vmem:[#allocation10 + $0x64] ss:$16 sps:$4 sm:$0xff]  }
  0xb0   :  { %690 = vmatprep.subr.bf16.mxu1 %v2360_v36  ;;  %v2407_v36 = vld [vmem:[#allocation10 + $0x6c] ss:$16 sps:$4 sm:$0xff]  }
  0xb3   :  { %691 = vmatpush1.bf16.msra.mxu1 %v2365_v37  ;;  %v2402_v37 = vld [vmem:[#allocation10 + $0x60] ss:$16 sps:$4 sm:$0xff]  }
  0xb4   :  { %692 = vmatprep.subr.bf16.mxu1 %v2366_v38  ;;  %v2405_v38 = vld [vmem:[#allocation10 + $0x68] ss:$16 sps:$4 sm:$0xff]  }
  0xb7   :  { %693 = vmatpush1.bf16.msra.mxu1 %v2371_v39  ;;  %v2410_v39 = vld [vmem:[#allocation10 + $0x84] ss:$16 sps:$4 sm:$0xff]  }
  0xb8   :  { %694 = vmatprep.subr.bf16.mxu1 %v2372_v40  ;;  %v2413_v40 = vld [vmem:[#allocation10 + $0x8c] ss:$16 sps:$4 sm:$0xff]  }
  0xbb   :  { %695 = vmatpush1.bf16.msra.mxu1 %v2377_v41  ;;  %v2408_v41 = vld [vmem:[#allocation10 + $0x80] ss:$16 sps:$4 sm:$0xff]  }
  0xbc   :  { %696 = vmatprep.subr.bf16.mxu1 %v2378_v42  ;;  %v2411_v42 = vld [vmem:[#allocation10 + $0x88] ss:$16 sps:$4 sm:$0xff]  }
  0xbf   :  { %697 = vmatpush1.bf16.msra.mxu1 %v2383_v15  ;;  %v2465_v15 = vld [vmem:[#allocation10 + $0x1a8] ss:$16 sps:$4 sm:$0xff]  }
  0xc0   :  { %1186 = vmatprep.subr.bf16.mxu1 %v2386_v18  ;;  %v2473_v18 = vld [vmem:[#allocation10 + $0x1cc] ss:$16 sps:$4 sm:$0xff]  }
 0x100   :  { %v147_v45 = vpop.permute.xlu0 %146 }
 0x101   :  { %vm148_vm1 = vcmp.eq.s32.totalorder %v144_v44, %v147_v45  ;;  %v2416_v44 = vld [vmem:[#allocation10 + $0xa4] ss:$16 sps:$4 sm:$0xff]   ;;  %v2419_v45 = vld [vmem:[#allocation10 + $0xac] ss:$16 sps:$4 sm:$0xff]  }
 0x102   :  { %vm1989_vm2 = vmpackc.low %vm148_vm1, %vm148_vm1 }
 0x103   :  { %2236 = vmatmul.mubr.msk.bf16.vlgmr.msra.gmra.mrb[0].mxu0 %vm1989_vm2, %v2880_v48  ;;  %v2422_v48 = vld [vmem:[#allocation10 + $0xc4] ss:$16 sps:$4 sm:$0xff]  }
 0x104   :  { %708 = vmatpush1.bf16.msra.mxu0 %v2290_v46  ;;  %739 = vmatprep.mubr.bf16.mxu0 %v259_v17  ;;  %v2414_v46 = vld [vmem:[#allocation10 + $0xa0] ss:$16 sps:$4 sm:$0xff]   ;;  %v2470_v17 = vld [vmem:[#allocation10 + $0x1c4] ss:$16 sps:$4 sm:$0xff]  }
 0x105   :  { %709 = vmatprep.subr.bf16.mxu0 %v2298_v47  ;;  %v2417_v47 = vld [vmem:[#allocation10 + $0xa8] ss:$16 sps:$4 sm:$0xff]  }
 0x108   :  { %710 = vmatpush1.bf16.msra.mxu0 %v2296_v49  ;;  %v2425_v49 = vld [vmem:[#allocation10 + $0xcc] ss:$16 sps:$4 sm:$0xff]  }
 0x109   :  { %711 = vmatprep.subr.bf16.mxu0 %v2304_v50  ;;  %v2420_v50 = vld [vmem:[#allocation10 + $0xc0] ss:$16 sps:$4 sm:$0xff]  }
 0x10c   :  { %712 = vmatpush1.bf16.msra.mxu0 %v2302_v51  ;;  %v2423_v51 = vld [vmem:[#allocation10 + $0xc8] ss:$16 sps:$4 sm:$0xff]  }
 0x10d   :  { %713 = vmatprep.subr.bf16.mxu0 %v2310_v52  ;;  %v2428_v52 = vld [vmem:[#allocation10 + $0xe4] ss:$16 sps:$4 sm:$0xff]  }
 0x110   :  { %714 = vmatpush1.bf16.msra.mxu0 %v2308_v53  ;;  %v2431_v53 = vld [vmem:[#allocation10 + $0xec] ss:$16 sps:$4 sm:$0xff]  }
 0x111   :  { %715 = vmatprep.subr.bf16.mxu0 %v2316_v54  ;;  %v2426_v54 = vld [vmem:[#allocation10 + $0xe0] ss:$16 sps:$4 sm:$0xff]  }
 0x114   :  { %716 = vmatpush1.bf16.msra.mxu0 %v2314_v55  ;;  %v2429_v55 = vld [vmem:[#allocation10 + $0xe8] ss:$16 sps:$4 sm:$0xff]  }
 0x115   :  { %717 = vmatprep.subr.bf16.mxu0 %v2322_v56  ;;  %v2434_v56 = vld [vmem:[#allocation10 + $0x104] ss:$16 sps:$4 sm:$0xff]  }
 0x118   :  { %718 = vmatpush1.bf16.msra.mxu0 %v2320_v57  ;;  %v2437_v57 = vld [vmem:[#allocation10 + $0x10c] ss:$16 sps:$4 sm:$0xff]  }
 0x119   :  { %719 = vmatprep.subr.bf16.mxu0 %v2328_v58  ;;  %v2432_v58 = vld [vmem:[#allocation10 + $0x100] ss:$16 sps:$4 sm:$0xff]  }
 0x11c   :  { %720 = vmatpush1.bf16.msra.mxu0 %v2326_v59  ;;  %v2435_v59 = vld [vmem:[#allocation10 + $0x108] ss:$16 sps:$4 sm:$0xff]  }
 0x11d   :  { %721 = vmatprep.subr.bf16.mxu0 %v2334_v60  ;;  %v2440_v60 = vld [vmem:[#allocation10 + $0x124] ss:$16 sps:$4 sm:$0xff]  }
 0x120   :  { %722 = vmatpush1.bf16.msra.mxu0 %v2332_v61  ;;  %v2443_v61 = vld [vmem:[#allocation10 + $0x12c] ss:$16 sps:$4 sm:$0xff]  }
 0x121   :  { %723 = vmatprep.subr.bf16.mxu0 %v2340_v62  ;;  %v2438_v62 = vld [vmem:[#allocation10 + $0x120] ss:$16 sps:$4 sm:$0xff]  }
 0x124   :  { %724 = vmatpush1.bf16.msra.mxu0 %v2338_v63  ;;  %v2441_v63 = vld [vmem:[#allocation10 + $0x128] ss:$16 sps:$4 sm:$0xff]  }
 0x125   :  { %725 = vmatprep.subr.bf16.mxu0 %v2346_v0  ;;  %v2446_v0 = vld [vmem:[#allocation10 + $0x144] ss:$16 sps:$4 sm:$0xff]  }
 0x128   :  { %726 = vmatpush1.bf16.msra.mxu0 %v2344_v2  ;;  %v2449_v2 = vld [vmem:[#allocation10 + $0x14c] ss:$16 sps:$4 sm:$0xff]  }
 0x129   :  { %727 = vmatprep.subr.bf16.mxu0 %v2352_v3  ;;  %v2444_v3 = vld [vmem:[#allocation10 + $0x140] ss:$16 sps:$4 sm:$0xff]  }
 0x12c   :  { %728 = vmatpush1.bf16.msra.mxu0 %v2350_v4  ;;  %v2447_v4 = vld [vmem:[#allocation10 + $0x148] ss:$16 sps:$4 sm:$0xff]  }
 0x12d   :  { %729 = vmatprep.subr.bf16.mxu0 %v2358_v5  ;;  %v2452_v5 = vld [vmem:[#allocation10 + $0x164] ss:$16 sps:$4 sm:$0xff]  }
 0x130   :  { %730 = vmatpush1.bf16.msra.mxu0 %v2356_v6  ;;  %v2455_v6 = vld [vmem:[#allocation10 + $0x16c] ss:$16 sps:$4 sm:$0xff]  }
 0x131   :  { %731 = vmatprep.subr.bf16.mxu0 %v2364_v7  ;;  %v2450_v7 = vld [vmem:[#allocation10 + $0x160] ss:$16 sps:$4 sm:$0xff]  }
 0x134   :  { %732 = vmatpush1.bf16.msra.mxu0 %v2362_v8  ;;  %v2453_v8 = vld [vmem:[#allocation10 + $0x168] ss:$16 sps:$4 sm:$0xff]  }
 0x135   :  { %733 = vmatprep.subr.bf16.mxu0 %v2370_v9  ;;  %v2458_v9 = vld [vmem:[#allocation10 + $0x184] ss:$16 sps:$4 sm:$0xff]  }
 0x138   :  { %734 = vmatpush1.bf16.msra.mxu0 %v2368_v10  ;;  %v2461_v10 = vld [vmem:[#allocation10 + $0x18c] ss:$16 sps:$4 sm:$0xff]  }
 0x139   :  { %735 = vmatprep.subr.bf16.mxu0 %v2376_v11  ;;  %v2456_v11 = vld [vmem:[#allocation10 + $0x180] ss:$16 sps:$4 sm:$0xff]  }
 0x13c   :  { %736 = vmatpush1.bf16.msra.mxu0 %v2374_v12  ;;  %v2459_v12 = vld [vmem:[#allocation10 + $0x188] ss:$16 sps:$4 sm:$0xff]  }
 0x13d   :  { %737 = vmatprep.subr.bf16.mxu0 %v2382_v13  ;;  %v2464_v13 = vld [vmem:[#allocation10 + $0x1a4] ss:$16 sps:$4 sm:$0xff]  }
 0x140   :  { %738 = vmatpush1.bf16.msra.mxu0 %v2380_v14  ;;  %v2462_v14 = vld [vmem:[#allocation10 + $0x1a0] ss:$16 sps:$4 sm:$0xff]  }
 0x141   :  { %1227 = vmatprep.subr.bf16.mxu0 %v2389_v19  ;;  %v775_v19 = vld [vmem:[#allocation5 + $0x8] sm:$0xff] }
 0x1d6   :  { %v250_v20 = vpop.f32.mrb[0].mxu0 }
 0x1d7   :  { %v258_v23 = vpack.c.bf16 %v250_v20, %v250_v20  ;;  %v2237_v24 = vpop.f32.mrb[1].mxu0  ;;  %v2468_v20 = vld [vmem:[#allocation10 + $0x1c0] ss:$16 sps:$4 sm:$0xff]  }
 0x1d8   :  { %v253_v27 = vpop.f32.mrb[2].mxu0  ;;  %v2479_v24 = vld [vmem:[#allocation10 + $0x1ec] ss:$16 sps:$4 sm:$0xff]  }
 0x1d9   :  { %v2238_v28 = vpop.f32.mrb[3].mxu0  ;;  %699 = vmatmul.mubr.bf16.vlgmr.msra.gmra.mrb[0].mxu1 %v258_v23  ;;  %740 = vmatmul.mubr.bf16.vlgmr.msra.gmra.mrb[4].mxu0 %v258_v23  ;;  %v2476_v23 = vld [vmem:[#allocation10 + $0x1e4] ss:$16 sps:$4 sm:$0xff]  }
 0x1da   :  { %1187 = vmatpush1.bf16.msra.mxu1 %v2384_v21  ;;  %1228 = vmatpush1.bf16.msra.mxu0 %v2387_v22  ;;  %v2471_v21 = vld [vmem:[#allocation10 + $0x1c8] ss:$16 sps:$4 sm:$0xff]   ;;  %v779_v22 = vpack.c.bf16 %v775_v19, %v775_v19  ;;  %v2482_v27 = vld [vmem:[#allocation11 + $0x4] ss:$16 sps:$4 sm:$0xff]   ;;  %v2485_v28 = vld [vmem:[#allocation11 + $0xc] ss:$16 sps:$4 sm:$0xff]  }
 0x1db   :  { %1188 = vmatprep.subr.bf16.mxu1 %v2392_v25  ;;  %1229 = vmatprep.subr.bf16.mxu0 %v2395_v26  ;;  %v2474_v25 = vld [vmem:[#allocation10 + $0x1e0] ss:$16 sps:$4 sm:$0xff]   ;;  %v2477_v26 = vld [vmem:[#allocation10 + $0x1e8] ss:$16 sps:$4 sm:$0xff]   ;;  %v2503_v19 = vld [vmem:[#allocation11 + $0x6c] ss:$16 sps:$4 sm:$0xff]  }
 0x1dc   :  { %1218 = vmatprep.mubr.bf16.mxu1 %v779_v22  ;;  %1259 = vmatprep.mubr.bf16.mxu0 %v779_v22  ;;  %v2506_v22 = vld [vmem:[#allocation11 + $0x84] ss:$16 sps:$4 sm:$0xff]  }
 0x1de   :  { %1189 = vmatpush1.bf16.msra.mxu1 %v2390_v29  ;;  %1230 = vmatpush1.bf16.msra.mxu0 %v2393_v30  ;;  %v327_v29 = vshrl.u32 %v143_v43, 7 }
 0x1df   :  { %1190 = vmatprep.subr.bf16.mxu1 %v2398_v31  ;;  %1231 = vmatprep.subr.bf16.mxu0 %v2401_v32  ;;  %v324_v31 = vld [vmem:[%s3184_s7] sm:$0xf] }
 0x1e0   :  { %v3093_v30 = vsub.s32 0, %v327_v29  ;;  %v3098_v32 = vsub.s32 1, %v327_v29 }
 0x1e2   :  { %1191 = vmatpush1.bf16.msra.mxu1 %v2396_v33  ;;  %1232 = vmatpush1.bf16.msra.mxu0 %v2399_v34  ;;  %v329_v33 = vrot.slane %v324_v31, %v3093_v30  ;;  %v333_v34 = vrot.slane %v324_v31, %v3098_v32 }
 0x1e3   :  { %1192 = vmatprep.subr.bf16.mxu1 %v2404_v35  ;;  %1233 = vmatprep.subr.bf16.mxu0 %v2407_v36 }
 0x1e6   :  { %1193 = vmatpush1.bf16.msra.mxu1 %v2402_v37  ;;  %1234 = vmatpush1.bf16.msra.mxu0 %v2405_v38  ;;  %v3102_v37 = vsub.s32 3, %v327_v29 }
 0x1e7   :  { %1194 = vmatprep.subr.bf16.mxu1 %v2410_v39  ;;  %1235 = vmatprep.subr.bf16.mxu0 %v2413_v40 }
 0x1ea   :  { %1195 = vmatpush1.bf16.msra.mxu1 %v2408_v41  ;;  %1236 = vmatpush1.bf16.msra.mxu0 %v2411_v42 }
 0x1eb   :  { %1196 = vmatprep.subr.bf16.mxu1 %v2416_v44  ;;  %1237 = vmatprep.subr.bf16.mxu0 %v2419_v45 }
 0x1ee   :  { %1197 = vmatpush1.bf16.msra.mxu1 %v2414_v46  ;;  %1238 = vmatpush1.bf16.msra.mxu0 %v2417_v47 }
 0x1ef   :  { %1198 = vmatprep.subr.bf16.mxu1 %v2422_v48  ;;  %1239 = vmatprep.subr.bf16.mxu0 %v2425_v49  ;;  %v341_v48 = vrot.slane %v324_v31, %v3102_v37  ;;  %v3105_v49 = vsub.s32 2, %v327_v29  ;;  %v2513_v29 = vld [vmem:[#allocation11 + $0xa8] ss:$16 sps:$4 sm:$0xff]  }
 0x1f2   :  { %1199 = vmatpush1.bf16.msra.mxu1 %v2420_v50  ;;  %1240 = vmatpush1.bf16.msra.mxu0 %v2423_v51  ;;  %v337_v51 = vrot.slane %v324_v31, %v3105_v49  ;;  %v2518_v31 = vld [vmem:[#allocation11 + $0xc4] ss:$16 sps:$4 sm:$0xff]  }
 0x1f3   :  { %1200 = vmatprep.subr.bf16.mxu1 %v2428_v52  ;;  %1241 = vmatprep.subr.bf16.mxu0 %v2431_v53 }
 0x1f6   :  { %1201 = vmatpush1.bf16.msra.mxu1 %v2426_v54  ;;  %1242 = vmatpush1.bf16.msra.mxu0 %v2429_v55 }
 0x1f7   :  { %1202 = vmatprep.subr.bf16.mxu1 %v2434_v56  ;;  %1243 = vmatprep.subr.bf16.mxu0 %v2437_v57 }
 0x1fa   :  { %1203 = vmatpush1.bf16.msra.mxu1 %v2432_v58  ;;  %1244 = vmatpush1.bf16.msra.mxu0 %v2435_v59 }
 0x1fb   :  { %1204 = vmatprep.subr.bf16.mxu1 %v2440_v60  ;;  %1245 = vmatprep.subr.bf16.mxu0 %v2443_v61  ;;  %v257_v60 = vld [vmem:[#allocation7] sm:$0xff] }
 0x1fe   :  { %1205 = vmatpush1.bf16.msra.mxu1 %v2438_v62  ;;  %1246 = vmatpush1.bf16.msra.mxu0 %v2441_v63 }
 0x1ff   :  { %1206 = vmatprep.subr.bf16.mxu1 %v2446_v0  ;;  %1247 = vmatprep.subr.bf16.mxu0 %v2449_v2 }
 0x202   :  { %1207 = vmatpush1.bf16.msra.mxu1 %v2444_v3  ;;  %1248 = vmatpush1.bf16.msra.mxu0 %v2447_v4 }
 0x203   :  { %1208 = vmatprep.subr.bf16.mxu1 %v2452_v5  ;;  %1249 = vmatprep.subr.bf16.mxu0 %v2455_v6 }
 0x206   :  { %1209 = vmatpush1.bf16.msra.mxu1 %v2450_v7  ;;  %1250 = vmatpush1.bf16.msra.mxu0 %v2453_v8  ;;  %v2480_v7 = vld [vmem:[#allocation11] ss:$16 sps:$4 sm:$0xff]   ;;  %v2483_v8 = vld [vmem:[#allocation11 + $0x8] ss:$16 sps:$4 sm:$0xff]  }
 0x207   :  { %1210 = vmatprep.subr.bf16.mxu1 %v2458_v9  ;;  %1251 = vmatprep.subr.bf16.mxu0 %v2461_v10  ;;  %v2488_v10 = vld [vmem:[#allocation11 + $0x24] ss:$16 sps:$4 sm:$0xff]  }
 0x20a   :  { %1211 = vmatpush1.bf16.msra.mxu1 %v2456_v11  ;;  %1252 = vmatpush1.bf16.msra.mxu0 %v2459_v12  ;;  %v2491_v11 = vld [vmem:[#allocation11 + $0x2c] ss:$16 sps:$4 sm:$0xff]   ;;  %v2486_v12 = vld [vmem:[#allocation11 + $0x20] ss:$16 sps:$4 sm:$0xff]  }
 0x20b   :  { %1212 = vmatprep.subr.bf16.mxu1 %v2464_v13  ;;  %1253 = vmatprep.subr.bf16.mxu0 %v2467_v16  ;;  %v2489_v13 = vld [vmem:[#allocation11 + $0x28] ss:$16 sps:$4 sm:$0xff]   ;;  %v2492_v16 = vld [vmem:[#allocation11 + $0x40] ss:$16 sps:$4 sm:$0xff]  }
 0x20e   :  { %1213 = vmatpush1.bf16.msra.mxu1 %v2462_v14  ;;  %1254 = vmatpush1.bf16.msra.mxu0 %v2465_v15  ;;  %v2494_v14 = vld [vmem:[#allocation11 + $0x44] ss:$16 sps:$4 sm:$0xff]   ;;  %v2497_v15 = vld [vmem:[#allocation11 + $0x4c] ss:$16 sps:$4 sm:$0xff]  }
 0x20f   :  { %1214 = vmatprep.subr.bf16.mxu1 %v2470_v17  ;;  %1255 = vmatprep.subr.bf16.mxu0 %v2473_v18  ;;  %v2495_v17 = vld [vmem:[#allocation11 + $0x48] ss:$16 sps:$4 sm:$0xff]   ;;  %v2500_v18 = vld [vmem:[#allocation11 + $0x64] ss:$16 sps:$4 sm:$0xff]  }
 0x212   :  { %1215 = vmatpush1.bf16.msra.mxu1 %v2468_v20  ;;  %1256 = vmatpush1.bf16.msra.mxu0 %v2471_v21  ;;  %v2498_v20 = vld [vmem:[#allocation11 + $0x60] ss:$16 sps:$4 sm:$0xff]   ;;  %v2501_v21 = vld [vmem:[#allocation11 + $0x68] ss:$16 sps:$4 sm:$0xff]  }
 0x213   :  { %1216 = vmatprep.subr.bf16.mxu1 %v2476_v23  ;;  %1257 = vmatprep.subr.bf16.mxu0 %v2479_v24  ;;  %v2509_v23 = vld [vmem:[#allocation11 + $0x8c] ss:$16 sps:$4 sm:$0xff]   ;;  %v2504_v24 = vld [vmem:[#allocation11 + $0x80] ss:$16 sps:$4 sm:$0xff]  }
 0x216   :  { %1217 = vmatpush1.bf16.msra.mxu1 %v2474_v25  ;;  %1258 = vmatpush1.bf16.msra.mxu0 %v2477_v26  ;;  %v2507_v25 = vld [vmem:[#allocation11 + $0x88] ss:$16 sps:$4 sm:$0xff]   ;;  %v2512_v26 = vld [vmem:[#allocation11 + $0xa4] ss:$16 sps:$4 sm:$0xff]  }
 0x217   :  { %1708 = vmatprep.subr.bf16.mxu1 %v2482_v27  ;;  %1749 = vmatprep.subr.bf16.mxu0 %v2485_v28  ;;  %v2515_v27 = vld [vmem:[#allocation11 + $0xac] ss:$16 sps:$4 sm:$0xff]   ;;  %v2510_v28 = vld [vmem:[#allocation11 + $0xa0] ss:$16 sps:$4 sm:$0xff]  }
 0x2ac   :  { %v700_v35 = vpop.f32.mrb[0].mxu1  ;;  %v741_v36 = vpop.f32.mrb[4].mxu0 }
 0x2ad   :  { %v701_v38 = vadd.f32 %v700_v35, %v329_v33  ;;  %v702_v39 = vpop.f32.mrb[1].mxu1  ;;  %v743_v40 = vpop.f32.mrb[5].mxu0  ;;  %v742_v53 = vadd.f32 %v741_v36, %v337_v51  ;;  %v2521_v33 = vld [vmem:[#allocation11 + $0xcc] ss:$16 sps:$4 sm:$0xff]   ;;  %v2519_v35 = vld [vmem:[#allocation11 + $0xc8] ss:$16 sps:$4 sm:$0xff]  }
 0x2ae   :  { %v703_v43 = vadd.f32 %v702_v39, %v333_v34  ;;  %v704_v41 = vpop.f32.mrb[2].mxu1  ;;  %v745_v42 = vpop.f32.mrb[6].mxu0  ;;  %v744_v50 = vadd.f32 %v743_v40, %v341_v48  ;;  %v2516_v34 = vld [vmem:[#allocation11 + $0xc0] ss:$16 sps:$4 sm:$0xff]   ;;  %v2524_v36 = vld [vmem:[#allocation11 + $0xe4] ss:$16 sps:$4 sm:$0xff]  }
 0x2af   :  { %v2055_v44 = vmul.f32 -1.442695, %v701_v38  ;;  %v705_v45 = vpop.f32.mrb[3].mxu1  ;;  %v746_v46 = vpop.f32.mrb[7].mxu0  ;;  %v2527_v38 = vld [vmem:[#allocation11 + $0xec] ss:$16 sps:$4 sm:$0xff]  }
 0x2b0   :  { %v2056_v47 = vmul.f32 -1.442695, %v703_v43  ;;  %v2057_v52 = vmul.f32 -1.442695, %v744_v50  ;;  %v2522_v39 = vld [vmem:[#allocation11 + $0xe0] ss:$16 sps:$4 sm:$0xff]  }
 0x2b1   :  { %2584 = vpow2.f32 %v2055_v44  ;;  %v2525_v40 = vld [vmem:[#allocation11 + $0xe8] ss:$16 sps:$4 sm:$0xff]   ;;  %v2530_v43 = vld [vmem:[#allocation11 + $0x104] ss:$16 sps:$4 sm:$0xff]   ;;  %v2533_v41 = vld [vmem:[#allocation11 + $0x10c] ss:$16 sps:$4 sm:$0xff]  }
 0x2b2   :  { %2586 = vpow2.f32 %v2056_v47  ;;  %v2528_v42 = vld [vmem:[#allocation11 + $0x100] ss:$16 sps:$4 sm:$0xff]   ;;  %v2531_v44 = vld [vmem:[#allocation11 + $0x108] ss:$16 sps:$4 sm:$0xff]   ;;  %v2536_v45 = vld [vmem:[#allocation11 + $0x124] ss:$16 sps:$4 sm:$0xff]  }
 0x2b3   :  { %2588 = vpow2.f32 %v2057_v52  ;;  %v2539_v46 = vld [vmem:[#allocation11 + $0x12c] ss:$16 sps:$4 sm:$0xff]   ;;  %v2534_v47 = vld [vmem:[#allocation11 + $0x120] ss:$16 sps:$4 sm:$0xff]   ;;  %v2537_v48 = vld [vmem:[#allocation11 + $0x128] ss:$16 sps:$4 sm:$0xff]  }
 0x2b4   :  { %2590 = vtanh.f32 %v742_v53  ;;  %v2542_v50 = vld [vmem:[#allocation11 + $0x144] ss:$16 sps:$4 sm:$0xff]   ;;  %v2545_v51 = vld [vmem:[#allocation11 + $0x14c] ss:$16 sps:$4 sm:$0xff]   ;;  %v2540_v52 = vld [vmem:[#allocation11 + $0x140] ss:$16 sps:$4 sm:$0xff]  }
 0x2b5   :  { %v2543_v53 = vld [vmem:[#allocation11 + $0x148] ss:$16 sps:$4 sm:$0xff]  }
 0x2bb   :  { %v2585_v54 = vpop.eup %2584 }
 0x2bc   :  { %v2587_v55 = vpop.eup %2586  ;;  %v751_v56 = vadd.f32 1.0, %v2585_v54  ;;  %v2548_v54 = vld [vmem:[#allocation11 + $0x164] ss:$16 sps:$4 sm:$0xff]  }
 0x2bd   :  { %v757_v57 = vadd.f32 1.0, %v2587_v55  ;;  %v2589_v58 = vpop.eup %2588  ;;  %v2551_v55 = vld [vmem:[#allocation11 + $0x16c] ss:$16 sps:$4 sm:$0xff]  }
 0x2be   :  { %2592 = vrcp.f32 %v751_v56  ;;  %v2591_v59 = vpop.eup %2590  ;;  %v764_v0 = vadd.f32 1.0, %v2589_v58  ;;  %v2546_v56 = vld [vmem:[#allocation11 + $0x160] ss:$16 sps:$4 sm:$0xff]   ;;  %v2554_v58 = vld [vmem:[#allocation11 + $0x184] ss:$16 sps:$4 sm:$0xff]  }
 0x2bf   :  { %2594 = vrcp.f32 %v757_v57  ;;  %v2549_v57 = vld [vmem:[#allocation11 + $0x168] ss:$16 sps:$4 sm:$0xff]  }
 0x2c0   :  { %2596 = vrcp.f32 %v764_v0  ;;  %v2561_v0 = vld [vmem:[#allocation11 + $0x1a8] ss:$16 sps:$4 sm:$0xff]  }
 0x2c8   :  { %v2593_v61 = vpop.eup %2592 }
 0x2c9   :  { %v2595_v62 = vpop.eup %2594  ;;  %v768_v63 = vmul.f32 %v2593_v61, %v2591_v59  ;;  %v2557_v59 = vld [vmem:[#allocation11 + $0x18c] ss:$16 sps:$4 sm:$0xff]   ;;  %v2555_v61 = vld [vmem:[#allocation11 + $0x188] ss:$16 sps:$4 sm:$0xff]  }
 0x2ca   :  { %v767_v2 = vmul.f32 %v2595_v62, %v257_v60  ;;  %v2597_v4 = vpop.eup %2596  ;;  %v2552_v60 = vld [vmem:[#allocation11 + $0x180] ss:$16 sps:$4 sm:$0xff]   ;;  %v2560_v62 = vld [vmem:[#allocation11 + $0x1a4] ss:$16 sps:$4 sm:$0xff]  }
 0x2cc   :  { %v769_v3 = vadd.f32 %v768_v63, %v767_v2  ;;  %v2558_v63 = vld [vmem:[#allocation11 + $0x1a0] ss:$16 sps:$4 sm:$0xff]   ;;  %v2563_v2 = vld [vmem:[#allocation11 + $0x1ac] ss:$16 sps:$4 sm:$0xff]  }
 0x2ce   :  { %2598 = vtanh.f32 %v769_v3  ;;  %773 = vst [vmem:[#allocation17] sm:$0xff] %v769_v3  ;;  %v2566_v3 = vld [vmem:[#allocation11 + $0x1c4] ss:$16 sps:$4 sm:$0xff]  }
 0x2d8   :  { %v2599_v5 = vpop.eup %2598 }
 0x2d9   :  { %v771_v6 = vmul.f32 %v2599_v5, %v2597_v4  ;;  %v2569_v4 = vld [vmem:[#allocation11 + $0x1cc] ss:$16 sps:$4 sm:$0xff]   ;;  %v1297_v5 = vld [vmem:[#allocation5 + $0x10] sm:$0xff] }
 0x2db   :  { %v778_v9 = vpack.c.bf16 %v771_v6, %v771_v6  ;;  %772 = vst [vmem:[#allocation15] sm:$0xff] %v771_v6  ;;  %v2564_v6 = vld [vmem:[#allocation11 + $0x1c0] ss:$16 sps:$4 sm:$0xff]  }
 0x2dd   :  { %1219 = vmatmul.mubr.bf16.vlgmr.msra.gmra.mrb[4].mxu1 %v778_v9  ;;  %1260 = vmatmul.mubr.bf16.vlgmr.msra.gmra.mrb[8].mxu0 %v778_v9  ;;  %v2572_v9 = vld [vmem:[#allocation11 + $0x1e4] ss:$16 sps:$4 sm:$0xff]  }
 0x2de   :  { %1709 = vmatpush1.bf16.msra.mxu1 %v2480_v7  ;;  %1750 = vmatpush1.bf16.msra.mxu0 %v2483_v8  ;;  %v2567_v7 = vld [vmem:[#allocation11 + $0x1c8] ss:$16 sps:$4 sm:$0xff]   ;;  %v1301_v8 = vpack.c.bf16 %v1297_v5, %v1297_v5 }
 0x2df   :  { %1710 = vmatprep.subr.bf16.mxu1 %v2488_v10  ;;  %1751 = vmatprep.subr.bf16.mxu0 %v2491_v11  ;;  %v2575_v10 = vld [vmem:[#allocation11 + $0x1ec] ss:$16 sps:$4 sm:$0xff]   ;;  %v2570_v11 = vld [vmem:[#allocation11 + $0x1e0] ss:$16 sps:$4 sm:$0xff]  }
 0x2e0   :  { %1740 = vmatprep.mubr.bf16.mxu1 %v1301_v8  ;;  %1781 = vmatprep.mubr.bf16.mxu0 %v1301_v8 }
 0x2e2   :  { %1711 = vmatpush1.bf16.msra.mxu1 %v2486_v12  ;;  %1752 = vmatpush1.bf16.msra.mxu0 %v2489_v13  ;;  %v2573_v12 = vld [vmem:[#allocation11 + $0x1e8] ss:$16 sps:$4 sm:$0xff]  }
 0x2e3   :  { %1712 = vmatprep.subr.bf16.mxu1 %v2494_v14  ;;  %1753 = vmatprep.subr.bf16.mxu0 %v2497_v15  ;;  %v844_v13 = vld [vmem:[%s3185_s8] sm:$0xf] }
 0x2e4   :  { %v849_v14 = vrot.slane %v844_v13, %v3093_v30  ;;  %v853_v15 = vrot.slane %v844_v13, %v3098_v32 }
 0x2e6   :  { %1713 = vmatpush1.bf16.msra.mxu1 %v2492_v16  ;;  %1754 = vmatpush1.bf16.msra.mxu0 %v2495_v17 }
 0x2e7   :  { %1714 = vmatprep.subr.bf16.mxu1 %v2500_v18  ;;  %1755 = vmatprep.subr.bf16.mxu0 %v2503_v19 }
 0x2ea   :  { %1715 = vmatpush1.bf16.msra.mxu1 %v2498_v20  ;;  %1756 = vmatpush1.bf16.msra.mxu0 %v2501_v21 }
 0x2eb   :  { %1716 = vmatprep.subr.bf16.mxu1 %v2506_v22  ;;  %1757 = vmatprep.subr.bf16.mxu0 %v2509_v23 }
 0x2ee   :  { %1717 = vmatpush1.bf16.msra.mxu1 %v2504_v24  ;;  %1758 = vmatpush1.bf16.msra.mxu0 %v2507_v25 }
 0x2ef   :  { %1718 = vmatprep.subr.bf16.mxu1 %v2512_v26  ;;  %1759 = vmatprep.subr.bf16.mxu0 %v2515_v27 }
 0x2f2   :  { %1719 = vmatpush1.bf16.msra.mxu1 %v2510_v28  ;;  %1760 = vmatpush1.bf16.msra.mxu0 %v2513_v29  ;;  %v861_v28 = vrot.slane %v844_v13, %v3102_v37 }
 0x2f3   :  { %1720 = vmatprep.subr.bf16.mxu1 %v2518_v31  ;;  %1761 = vmatprep.subr.bf16.mxu0 %v2521_v33  ;;  %v857_v31 = vrot.slane %v844_v13, %v3105_v49 }
 0x2f6   :  { %1721 = vmatpush1.bf16.msra.mxu1 %v2516_v34  ;;  %1762 = vmatpush1.bf16.msra.mxu0 %v2519_v35 }
 0x2f7   :  { %1722 = vmatprep.subr.bf16.mxu1 %v2524_v36  ;;  %1763 = vmatprep.subr.bf16.mxu0 %v2527_v38 }
 0x2fa   :  { %1723 = vmatpush1.bf16.msra.mxu1 %v2522_v39  ;;  %1764 = vmatpush1.bf16.msra.mxu0 %v2525_v40 }
 0x2fb   :  { %1724 = vmatprep.subr.bf16.mxu1 %v2530_v43  ;;  %1765 = vmatprep.subr.bf16.mxu0 %v2533_v41  ;;  %v777_v41 = vld [vmem:[#allocation7 + $0x8] sm:$0xff] }
 0x2fe   :  { %1725 = vmatpush1.bf16.msra.mxu1 %v2528_v42  ;;  %1766 = vmatpush1.bf16.msra.mxu0 %v2531_v44 }
 0x2ff   :  { %1726 = vmatprep.subr.bf16.mxu1 %v2536_v45  ;;  %1767 = vmatprep.subr.bf16.mxu0 %v2539_v46 }
 0x302   :  { %1727 = vmatpush1.bf16.msra.mxu1 %v2534_v47  ;;  %1768 = vmatpush1.bf16.msra.mxu0 %v2537_v48 }
 0x303   :  { %1728 = vmatprep.subr.bf16.mxu1 %v2542_v50  ;;  %1769 = vmatprep.subr.bf16.mxu0 %v2545_v51 }
 0x306   :  { %1729 = vmatpush1.bf16.msra.mxu1 %v2540_v52  ;;  %1770 = vmatpush1.bf16.msra.mxu0 %v2543_v53 }
 0x307   :  { %1730 = vmatprep.subr.bf16.mxu1 %v2548_v54  ;;  %1771 = vmatprep.subr.bf16.mxu0 %v2551_v55  ;;  %v2576_v54 = vld [vmem:[#allocation13] sm:$0xff]   ;;  %v2577_v55 = vld [vmem:[#allocation13 + $0x8] sm:$0xff]  }
 0x30a   :  { %1731 = vmatpush1.bf16.msra.mxu1 %v2546_v56  ;;  %1772 = vmatpush1.bf16.msra.mxu0 %v2549_v57  ;;  %v2578_v56 = vld [vmem:[#allocation13 + $0x10] sm:$0xff]   ;;  %v2579_v57 = vld [vmem:[#allocation13 + $0x18] sm:$0xff]  }
 0x30b   :  { %1732 = vmatprep.subr.bf16.mxu1 %v2554_v58  ;;  %1773 = vmatprep.subr.bf16.mxu0 %v2557_v59  ;;  %v2580_v58 = vld [vmem:[#allocation13 + $0x20] sm:$0xff]   ;;  %v2581_v59 = vld [vmem:[#allocation13 + $0x28] sm:$0xff]  }
 0x30e   :  { %1733 = vmatpush1.bf16.msra.mxu1 %v2552_v60  ;;  %1774 = vmatpush1.bf16.msra.mxu0 %v2555_v61  ;;  %v2582_v60 = vld [vmem:[#allocation13 + $0x30] sm:$0xff]   ;;  %v2583_v61 = vld [vmem:[#allocation13 + $0x38] sm:$0xff]  }
 0x30f   :  { %1734 = vmatprep.subr.bf16.mxu1 %v2560_v62  ;;  %1775 = vmatprep.subr.bf16.mxu0 %v2563_v2  ;;  %v1366_v62 = vld [vmem:[%s3186_s9] sm:$0xf]  ;;  %s2881_s9 = smov [#allocation15]  }
 0x310   :  { %v1383_v13 = vrot.slane %v1366_v62, %v3102_v37  ;;  %s1946_s17 = sshll.u32 %s2881_s9, 4  ;;  %s1947_s17 = int_to_ptr.vmem [resolvable:$true] %s1946_s17 }
 0x311   :  { %s2786_s18 = scalar_lea.vmem %s1947_s17, 384  ;;  %p2791_p1 = scmp.lt.s32.totalorder %s1947_s17, %s1947_s17 }
 0x312   :  { %1735 = vmatpush1.bf16.msra.mxu1 %v2558_v63  ;;  %1776 = vmatpush1.bf16.msra.mxu0 %v2561_v0  ;;  %v1371_v63 = vrot.slane %v1366_v62, %v3093_v30  ;;  %v1375_v0 = vrot.slane %v1366_v62, %v3098_v32  ;;  %v1379_v30 = vrot.slane %v1366_v62, %v3105_v49  ;;  %p2787_p0 = scmp.ne.s32.totalorder %s1947_s17, %s2786_s18  ;;  %p2792_p2 = scmp.lt.s32.totalorder %s2786_s18, %s2786_s18 }
 0x313   :  { %1736 = vmatprep.subr.bf16.mxu1 %v2566_v3  ;;  %1777 = vmatprep.subr.bf16.mxu0 %v2569_v4 }
 0x314   :  { %p2793_p3 = por %p2792_p2, %p2791_p1 }
 0x316   :  { %1737 = vmatpush1.bf16.msra.mxu1 %v2564_v6  ;;  %1778 = vmatpush1.bf16.msra.mxu0 %v2567_v7  ;;  %p2794_p4 = pnand %p2793_p3, %p2787_p0 }
 0x317   :  { %1738 = vmatprep.subr.bf16.mxu1 %v2572_v9  ;;  %1779 = vmatprep.subr.bf16.mxu0 %v2575_v10 }
 0x31a   :  { %1739 = vmatpush1.bf16.msra.mxu1 %v2570_v11  ;;  %1780 = vmatpush1.bf16.msra.mxu0 %v2573_v12 }
 0x31b   :  { %2239 = vmatprep.subr.bf16.mxu1 %v2878_v1 }
 0x3b0   :  { %v1220_v16 = vpop.f32.mrb[4].mxu1  ;;  %v1261_v17 = vpop.f32.mrb[8].mxu0 }
 0x3b1   :  { %v1221_v18 = vadd.f32 %v1220_v16, %v849_v14  ;;  %v1222_v19 = vpop.f32.mrb[5].mxu1  ;;  %v1263_v20 = vpop.f32.mrb[9].mxu0  ;;  %v1262_v34 = vadd.f32 %v1261_v17, %v857_v31 }
 0x3b2   :  { %v1223_v21 = vadd.f32 %v1222_v19, %v853_v15  ;;  %v1224_v22 = vpop.f32.mrb[6].mxu1  ;;  %v1265_v23 = vpop.f32.mrb[10].mxu0  ;;  %v1264_v29 = vadd.f32 %v1263_v20, %v861_v28 }
 0x3b3   :  { %v2122_v24 = vmul.f32 -1.442695, %v1221_v18  ;;  %v1225_v25 = vpop.f32.mrb[7].mxu1  ;;  %v1266_v26 = vpop.f32.mrb[11].mxu0  ;;  %v1299_v22 = vld [vmem:[#allocation7 + $0x10] sm:$0xff] }
 0x3b4   :  { %v2123_v27 = vmul.f32 -1.442695, %v1223_v21  ;;  %v2124_v33 = vmul.f32 -1.442695, %v1264_v29 }
 0x3b5   :  { %2600 = vpow2.f32 %v2122_v24 }
 0x3b6   :  { %2602 = vpow2.f32 %v2123_v27 }
 0x3b7   :  { %2604 = vpow2.f32 %v2124_v33 }
 0x3b8   :  { %2606 = vtanh.f32 %v1262_v34 }
 0x3bf   :  { %v2601_v35 = vpop.eup %2600 }
 0x3c0   :  { %v2603_v36 = vpop.eup %2602  ;;  %v1271_v38 = vadd.f32 1.0, %v2601_v35 }
 0x3c1   :  { %v1277_v39 = vadd.f32 1.0, %v2603_v36  ;;  %v2605_v40 = vpop.eup %2604 }
 0x3c2   :  { %2608 = vrcp.f32 %v1271_v38  ;;  %v2607_v43 = vpop.eup %2606  ;;  %v1284_v46 = vadd.f32 1.0, %v2605_v40 }
 0x3c3   :  { %2610 = vrcp.f32 %v1277_v39 }
 0x3c4   :  { %2612 = vrcp.f32 %v1284_v46 }
 0x3cc   :  { %v2609_v42 = vpop.eup %2608 }
 0x3cd   :  { %v2611_v44 = vpop.eup %2610  ;;  %v1288_v45 = vmul.f32 %v2609_v42, %v2607_v43 }
 0x3ce   :  { %v1287_v47 = vmul.f32 %v2611_v44, %v777_v41  ;;  %v2613_v50 = vpop.eup %2612 }
 0x3d0   :  { %v1289_v48 = vadd.f32 %v1288_v45, %v1287_v47 }
 0x3d2   :  { %2614 = vtanh.f32 %v1289_v48  ;;  %1295 = vst [vmem:[#allocation17 + $0x8] sm:$0xff] %v1289_v48 }
 0x3dc   :  { %v2615_v51 = vpop.eup %2614 }
 0x3dd   :  { %v1291_v52 = vmul.f32 %v2615_v51, %v2613_v50 }
 0x3df   :  { %v1300_v53 = vpack.c.bf16 %v1291_v52, %v1291_v52  ;;  %1293 = vst [vmem:[#allocation15 + $0x8] sm:$0xff] %v1291_v52 }
 0x3e1   :  { %1741 = vmatmul.mubr.bf16.vlgmr.msra.gmra.mrb[8].mxu1 %v1300_v53  ;;  %1782 = vmatmul.mubr.bf16.vlgmr.msra.gmra.mrb[12].mxu0 %v1300_v53 }
 0x3e2   :  { %2255 = vmatprep.mubr.msk.bf16.mxu1 %vm2879_vm0, %v2878_v1  ;;  %2240 = vmatpush3.bf16.msra.mxu1 %v2576_v54 }
 0x3e3   :  { %2241 = vmatprep.subr.bf16.mxu1 %v2878_v1 }
 0x3e6   :  { %2242 = vmatpush3.bf16.msra.mxu1 %v2577_v55 }
 0x3e7   :  { %2243 = vmatprep.subr.bf16.mxu1 %v2878_v1 }
 0x3ea   :  { %2244 = vmatpush3.bf16.msra.mxu1 %v2578_v56 }
 0x3eb   :  { %2245 = vmatprep.subr.bf16.mxu1 %v2878_v1 }
 0x3ee   :  { %2246 = vmatpush3.bf16.msra.mxu1 %v2579_v57 }
 0x3ef   :  { %2247 = vmatprep.subr.bf16.mxu1 %v2878_v1 }
 0x3f2   :  { %2248 = vmatpush3.bf16.msra.mxu1 %v2580_v58 }
 0x3f3   :  { %2249 = vmatprep.subr.bf16.mxu1 %v2878_v1 }
 0x3f6   :  { %2250 = vmatpush3.bf16.msra.mxu1 %v2581_v59 }
 0x3f7   :  { %2251 = vmatprep.subr.bf16.mxu1 %v2878_v1 }
 0x3fa   :  { %2252 = vmatpush3.bf16.msra.mxu1 %v2582_v60 }
 0x3fb   :  { %2253 = vmatprep.subr.bf16.mxu1 %v2878_v1 }
 0x3fe   :  { %2254 = vmatpush3.bf16.msra.mxu1 %v2583_v61 }
 0x4b4   :  { %v1742_v2 = vpop.f32.mrb[8].mxu1  ;;  %v1783_v3 = vpop.f32.mrb[12].mxu0 }
 0x4b5   :  { %v1743_v4 = vadd.f32 %v1742_v2, %v1371_v63  ;;  %v1744_v5 = vpop.f32.mrb[9].mxu1  ;;  %v1785_v6 = vpop.f32.mrb[13].mxu0  ;;  %v1784_v15 = vadd.f32 %v1783_v3, %v1379_v30 }
 0x4b6   :  { %v1745_v7 = vadd.f32 %v1744_v5, %v1375_v0  ;;  %v1746_v8 = vpop.f32.mrb[10].mxu1  ;;  %v1787_v9 = vpop.f32.mrb[14].mxu0  ;;  %v1786_v14 = vadd.f32 %v1785_v6, %v1383_v13 }
 0x4b7   :  { %v2189_v10 = vmul.f32 -1.442695, %v1743_v4  ;;  %v1747_v11 = vpop.f32.mrb[11].mxu1  ;;  %v1788_v1 = vpop.f32.mrb[15].mxu0 }
 0x4b8   :  { %v2190_v12 = vmul.f32 -1.442695, %v1745_v7  ;;  %v2191_v32 = vmul.f32 -1.442695, %v1786_v14 }
 0x4b9   :  { %2616 = vpow2.f32 %v2189_v10 }
 0x4ba   :  { %2618 = vpow2.f32 %v2190_v12 }
 0x4bb   :  { %2620 = vpow2.f32 %v2191_v32 }
 0x4bc   :  { %2622 = vtanh.f32 %v1784_v15 }
 0x4c3   :  { %v2617_v16 = vpop.eup %2616 }
 0x4c4   :  { %v2619_v17 = vpop.eup %2618  ;;  %v1793_v18 = vadd.f32 1.0, %v2617_v16 }
 0x4c5   :  { %v1799_v19 = vadd.f32 1.0, %v2619_v17  ;;  %v2621_v20 = vpop.eup %2620 }
 0x4c6   :  { %2624 = vrcp.f32 %v1793_v18  ;;  %v2623_v21 = vpop.eup %2622  ;;  %v1806_v25 = vadd.f32 1.0, %v2621_v20 }
 0x4c7   :  { %2626 = vrcp.f32 %v1799_v19 }
 0x4c8   :  { %2628 = vrcp.f32 %v1806_v25 }
 0x4d0   :  { %v2625_v23 = vpop.eup %2624 }
 0x4d1   :  { %v2627_v37 = vpop.eup %2626  ;;  %v1810_v24 = vmul.f32 %v2625_v23, %v2623_v21 }
 0x4d2   :  { %v1809_v26 = vmul.f32 %v2627_v37, %v1299_v22  ;;  %v2629_v49 = vpop.eup %2628 }
 0x4d4   :  { %v1811_v27 = vadd.f32 %v1810_v24, %v1809_v26 }
 0x4d6   :  { %2630 = vtanh.f32 %v1811_v27  ;;  %1817 = vst [vmem:[#allocation17 + $0x10] sm:$0xff] %v1811_v27 }
 0x4e0   :  { %v2631_v28 = vpop.eup %2630 }
 0x4e1   :  { %v1813_v29 = vmul.f32 %v2631_v28, %v2629_v49 }
 0x4e3   :  { %v1818_v31 = vpack.c.bf16 %v1813_v29, %v1813_v29  ;;  %1815 = vst [vmem:[#allocation15 + $0x10] sm:$0xff] %v1813_v29 }
 0x4e5   :  { %2256 = vmatmul.mubr.bf16.vlgmr.msra.gmra.mrb[12].mxu1 %v1818_v31 }
 0x4e6   :  { %2797 = shalt.err (!%p2794_p4)
}
 0x4e7   :  { %s2798_s19 = scalar_lea.hbm %s3190_s13, 384 }
 0x4e8   :  { %p2799_p5 = scmp.ne.s32.totalorder %s3190_s13, %s2798_s19  ;;  %p2802_p6 = scmp.lt.u32.totalorder %s2798_s19, %s3190_s13 }
 0x4ea   :  { %p2804_p7 = pnand %p2802_p6, %p2799_p5 }
 0x4ec   :  { %2807 = shalt.err (!%p2804_p7)
}
 0x4ed   :  { %1952 = dma.vmem_to_hbm [thread:$0]  %s1947_s17, 384, %s3190_s13, [#allocation16], %s3194_s15, %s3194_s15, %s2866_s24  }
 0x4ee   :  { %s2882_s23 = smov [#allocation17]  }
 0x4ef   :  { %s1958_s29 = sshll.u32 %s2882_s23, 4  ;;  %s1959_s29 = int_to_ptr.vmem [resolvable:$true] %s1958_s29 }
 0x4f0   :  { %s2808_s16 = scalar_lea.vmem %s1959_s29, 384  ;;  %p2813_p9 = scmp.lt.s32.totalorder %s1959_s29, %s1959_s29 }
 0x4f1   :  { %p2809_p8 = scmp.ne.s32.totalorder %s1959_s29, %s2808_s16  ;;  %p2814_p10 = scmp.lt.s32.totalorder %s2808_s16, %s2808_s16 }
 0x4f3   :  { %p2815_p11 = por %p2814_p10, %p2813_p9 }
 0x4f5   :  { %p2816_p12 = pnand %p2815_p11, %p2809_p8 }
 0x4f7   :  { %2819 = shalt.err (!%p2816_p12)
}
 0x4f8   :  { %s2820_s30 = scalar_lea.hbm %s3191_s14, 384 }
 0x4f9   :  { %p2821_p13 = scmp.ne.s32.totalorder %s3191_s14, %s2820_s30  ;;  %p2824_p0 = scmp.lt.u32.totalorder %s2820_s30, %s3191_s14 }
 0x4fb   :  { %p2826_p1 = pnand %p2824_p0, %p2821_p13 }
 0x4fd   :  { %2829 = shalt.err (!%p2826_p1)
}
 0x4fe   :  { %1964 = dma.vmem_to_hbm [thread:$0]  %s1959_s29, 384, %s3191_s14, [#allocation16], %s3194_s15, %s3194_s15, %s2866_s24  }
 0x4ff   :  { %v2192_v33 = vld [vmem:[%s3188_s11] ss:$0 sm:$0xff]  ;;  %s2883_s9 = smov [#allocation14]  }
 0x500   :  { %s1937_s17 = sshll.u32 %s2883_s9, 4  ;;  %s1938_s17 = int_to_ptr.vmem [resolvable:$true] %s1937_s17 }
 0x501   :  { %s2830_s18 = scalar_lea.vmem %s1938_s17, 128  ;;  %p2835_p3 = scmp.lt.s32.totalorder %s1938_s17, %s1938_s17 }
 0x502   :  { %p2831_p2 = scmp.ne.s32.totalorder %s1938_s17, %s2830_s18  ;;  %p2836_p4 = scmp.lt.s32.totalorder %s2830_s18, %s2830_s18 }
 0x504   :  { %p2837_p5 = por %p2836_p4, %p2835_p3 }
 0x506   :  { %p2838_p6 = pnand %p2837_p5, %p2831_p2 }
 0x5b8   :  { %v1924_v34 = vpop.f32.mrb[12].mxu1 }
 0x5b9   :  { %v1925_v35 = vadd.f32 %v2192_v33, %v1924_v34  ;;  %v2257_v36 = vpop.f32.mrb[13].mxu1 }
 0x5ba   :  { %v1927_v38 = vpop.f32.mrb[14].mxu1 }
 0x5bb   :  { %1930 = vst [vmem:[#allocation14] sm:$0xff] %v1925_v35  ;;  %v2258_v39 = vpop.f32.mrb[15].mxu1 }
 0x5bc   :  { %2841 = shalt.err (!%p2838_p6)
}
 0x5bd   :  { %s2842_s11 = scalar_lea.hbm %s3189_s12, 128 }
 0x5be   :  { %p2843_p7 = scmp.ne.s32.totalorder %s3189_s12, %s2842_s11  ;;  %p2846_p8 = scmp.lt.u32.totalorder %s2842_s11, %s3189_s12 }
 0x5c0   :  { %p2848_p9 = pnand %p2846_p8, %p2843_p7 }
 0x5c2   :  { %2851 = shalt.err (!%p2848_p9)
}
 0x5c3   :  { %1940 = dma.vmem_to_hbm [thread:$0]  %s1938_s17, 128, %s3189_s12, [#allocation4]  }
 0x5c4   :  { %2860 = dma.done.wait [#allocation4], 128  }
 0x5c5   :  { %2861 = vsyncadd [#allocation4], 4294967168 }
 0x5c6   :  { %2862 = dma.done.wait [#allocation16], 768  }
 0x5c7   :  { %2863 = vsyncadd [#allocation16], 4294966528 }
 0x5c8   :  { %1974 = vsyncpa [#allocation3], 1 }
 0x5c9   :  { %1975 = vsyncpa [#allocation6], 1 }
 0x5ca   :  { %1976 = vsyncpa [#allocation9], 1 }
 0x5cb   :  { %1977 = vsyncpa [#allocation12], 1 }
 0x5cc   :  { %1978 = vsyncpa [#allocation4], 1 }
 0x5cd   :  { %1979 = vsyncpa [#allocation16], 1 }

</bundles_post_ra>
